<compile_context>
chip_gen: v6e
topology: v6e:2x2x1
jax: 0.10.0
libtpu: 0.0.40
codegen_flags: <defaults>
</compile_context>

<pallas_src>
import functools

import jax
import jax.numpy as jnp
from jax.experimental import pallas as pl
from jax.experimental.pallas import tpu as pltpu

NEG_SLOPE = 0.2      # LeakyReLU slope used by GAT attention
MASK_VAL = -1e30     # masked logit
M_INIT = -1e9        # online-softmax running-max init (finite: avoids inf-inf)


def _round_up(a, b):
    return (a + b - 1) // b * b


def _vmem_capacity():
    try:
        return int(pltpu.get_tpu_info().vmem_capacity_bytes)
    except Exception:
        return 64 * 1024 * 1024   # conservative (v7x per-core)


def _tiling(n, cap):
    """Return (n_pad, tn_dst_tile, ts_src_chunk), generation aware."""
    if n <= 512:
        n_pad = _round_up(n, 16)          # sublane-pair aligned, single tile
        return n_pad, n_pad, n_pad
    ts = 128
    tn = 512 if (cap >= 100 * (1 << 20) and n >= 2048) else 128
    return _round_up(n, tn), tn, ts


def _vmem_limit_bytes(tn, ts, h, d, cap):
    lane = 128
    hd = _round_up(h * d, lane)
    dp = _round_up(d, lane)
    tsp = _round_up(ts, lane)
    per_buf = (tn * lane * 4          # logit_dst tile (H lanes -> padded 128)
               + 8 * tsp * 4          # logit_src tile
               + ts * hd * 2          # z tile (bf16)
               + tn * tsp * 2         # adj tile (bf16)
               + 8 * dp * 4           # bias
               + tn * dp * 4)         # output tile
    scratch = 2 * h * tn * lane * 4 + h * tn * dp * 4   # m, l, acc
    inter = 8 * tn * tsp * 4                            # e/p/mask spill headroom
    need = 2 * per_buf + scratch + inter
    return int(min(max(need * 3 // 2, 32 << 20), cap * 4 // 5))


# ---------------------------------------------------------------------------
# Stage 1: multi-head GAT, 2-D grid (dst tile x src chunk), online softmax.
# ---------------------------------------------------------------------------
def _gat_kernel(
    ld_ref,     # [TN, H]    dst attention logits (f32)
    ls_ref,     # [H, TS]    src attention logits (f32)
    z_ref,      # [TS, H*D]  transformed source features (bf16)
    adj_ref,    # [TN, TS]   adjacency tile (bf16, adj[i, j]=1 iff edge j->i)
    bias_ref,   # [1, D]     f32
    x_att_ref,  # [TN, D]    output tile (resident across src axis)
    m_sc,       # [H, TN, 1] running max
    l_sc,       # [H, TN, 1] running denominator
    acc_sc,     # [H, TN, D] running weighted sum
):
    H = m_sc.shape[0]
    D = bias_ref.shape[1]
    j = pl.program_id(1)

    @pl.when(j == 0)
    def _init():
        m_sc[...] = jnp.full_like(m_sc, M_INIT)
        l_sc[...] = jnp.zeros_like(l_sc)
        acc_sc[...] = jnp.zeros_like(acc_sc)

    mask = adj_ref[...] > 0                     # [TN, TS]
    z = z_ref[...]                              # [TS, H*D] bf16
    ld = ld_ref[...]                            # [TN, H]
    ls = ls_ref[...]                            # [H, TS]

    for h in range(H):                          # small & static
        e = ld[:, h:h + 1] + ls[h:h + 1, :]     # [TN, TS]
        e = jnp.where(e > 0, e, NEG_SLOPE * e)  # LeakyReLU(0.2)
        e = jnp.where(mask, e, MASK_VAL)        # single mask pass
        m_old = m_sc[h]                         # [TN, 1]
        m_new = jnp.maximum(m_old, jnp.max(e, axis=-1, keepdims=True))
        corr = jnp.exp(m_old - m_new)           # [TN, 1]
        p = jnp.exp(e - m_new)                  # masked entries underflow to 0
        l_sc[h] = corr * l_sc[h] + jnp.sum(p, axis=-1, keepdims=True)
        acc_sc[h] = corr * acc_sc[h] + jnp.dot(
            p.astype(jnp.bfloat16), z[:, h * D:(h + 1) * D],
            preferred_element_type=jnp.float32)
        m_sc[h] = m_new

    @pl.when(j == pl.num_programs(1) - 1)
    def _finalize():
        tn = x_att_ref.shape[0]
        out = jnp.zeros((tn, D), jnp.float32)
        for h in range(H):
            out = out + acc_sc[h] * pl.reciprocal(l_sc[h], approx=True)
        x_att_ref[...] = out * (1.0 / H) + bias_ref[...]


# ---------------------------------------------------------------------------
# Stage 2: attention readout + FF (tiny, fully resident, f32).
# ---------------------------------------------------------------------------
def _readout_ff_kernel(
    x_att_ref,    # [Np, D]
    seg_ref,      # [B, Np]  one-hot graph membership (0 for padded nodes)
    seg_t_ref,    # [Np, B]
    inv_cnt_ref,  # [B, 1]
    xg_ref,       # [B, Gh]
    w_read_ref,   # [D, D]
    w1g_ref,      # [Gh, D]
    w1p_ref,      # [D, D]
    b1_ref,       # [1, D]
    w2_ref,       # [D, D]
    b2_ref,       # [1, D]
    x_local_ref,  # [B, D]
):
    x_att = x_att_ref[...]
    seg = seg_ref[...]
    seg_t = seg_t_ref[...]

    mean = jnp.dot(seg, x_att, preferred_element_type=jnp.float32) * inv_cnt_ref[...]
    t_glob = jnp.tanh(jnp.dot(mean, w_read_ref[...],
                              preferred_element_type=jnp.float32))        # [B, D]
    t_node = jnp.dot(seg_t, t_glob, preferred_element_type=jnp.float32)   # [Np, D]
    coef = jax.nn.sigmoid(jnp.sum(x_att * t_node, axis=-1, keepdims=True))
    pool = jnp.dot(seg, coef * x_att, preferred_element_type=jnp.float32)  # [B, D]

    # cat(x_global, pool) @ W1 == x_global @ W1g + pool @ W1p
    h1 = (jnp.dot(xg_ref[...], w1g_ref[...], preferred_element_type=jnp.float32)
          + jnp.dot(pool, w1p_ref[...], preferred_element_type=jnp.float32)
          + b1_ref[...])
    h1 = h1 * jax.nn.sigmoid(h1)                                           # SiLU
    x_local_ref[...] = (jnp.dot(h1, w2_ref[...],
                                preferred_element_type=jnp.float32)
                        + b2_ref[...])


# ---------------------------------------------------------------------------
# Wrapper
# ---------------------------------------------------------------------------
@functools.partial(jax.jit, static_argnames=("num_graphs",))
def hlocal_pool(x, edge_index, batch, x_global, params, *, num_graphs):
    N, D = x.shape
    B = num_graphs
    H = params["w_gat"].shape[0]

    cap = _vmem_capacity()
    n_pad, tn, ts = _tiling(N, cap)
    pad = n_pad - N

    # ---- pad nodes (review #11: no ragged / full-resident fallback) ----
    x_pad = jnp.pad(x, ((0, pad), (0, 0)))
    batch_pad = jnp.pad(batch, (0, pad), constant_values=B)   # out-of-range id

    # ---- glue: densify graph structure (plain JAX; scatter stays outside) ----
    src, dst = edge_index[0], edge_index[1]
    adj = jnp.zeros((n_pad, n_pad), jnp.float32).at[dst, src].set(1.0)
    adj = jnp.maximum(adj, jnp.eye(n_pad, dtype=jnp.float32))  # self loops
    adj = adj.astype(jnp.bfloat16)                             # O(N^2) -> bf16

    seg = (batch_pad[None, :] == jnp.arange(B)[:, None]).astype(jnp.float32)
    seg_t = seg.T
    cnt = jnp.maximum(jnp.sum(seg, axis=-1, keepdims=True), 1.0)
    inv_cnt = 1.0 / cnt

    # ---- hoisted tile-invariant transforms (review #1): computed ONCE in XLA ----
    w_gat = params["w_gat"]                                       # [H, D, D]
    w_gat_flat = jnp.transpose(w_gat, (1, 0, 2)).reshape(D, H * D)
    z_all = jnp.dot(x_pad, w_gat_flat).astype(jnp.bfloat16)       # [Np, H*D]
    # logit(x, h) = (x @ W_h) . a_h == x . (W_h @ a_h)
    u_src = jnp.einsum("hki,hi->hk", w_gat, params["a_src"])      # [H, D]
    u_dst = jnp.einsum("hki,hi->hk", w_gat, params["a_dst"])      # [H, D]
    logit_src_t = jnp.dot(u_src, x_pad.T)                         # [H, Np] f32
    logit_dst = jnp.dot(x_pad, u_dst.T)                           # [Np, H] f32

    # ---- Stage 1: 2-D grid (dst tile, src chunk) online-softmax GAT ----
    grid = (n_pad // tn, n_pad // ts)
    vmem_limit = _vmem_limit_bytes(tn, ts, H, D, cap)

    x_att_pad = pl.pallas_call(
        _gat_kernel,
        out_shape=jax.ShapeDtypeStruct((n_pad, D), jnp.float32),
        grid_spec=pltpu.PrefetchScalarGridSpec(
            num_scalar_prefetch=0,
            grid=grid,
            in_specs=[
                pl.BlockSpec((tn, H), lambda i, j: (i, 0)),        # logit_dst
                pl.BlockSpec((H, ts), lambda i, j: (0, j)),        # logit_src^T
                pl.BlockSpec((ts, H * D), lambda i, j: (j, 0)),    # z (src rows)
                pl.BlockSpec((tn, ts), lambda i, j: (i, j)),       # adj tile
                pl.BlockSpec((1, D), lambda i, j: (0, 0)),         # bias
            ],
            out_specs=pl.BlockSpec((tn, D), lambda i, j: (i, 0)),
            scratch_shapes=[
                pltpu.VMEM((H, tn, 1), jnp.float32),   # running max
                pltpu.VMEM((H, tn, 1), jnp.float32),   # running denom
                pltpu.VMEM((H, tn, D), jnp.float32),   # running acc
            ],
        ),
        compiler_params=pltpu.CompilerParams(
            dimension_semantics=("parallel", "arbitrary"),
            vmem_limit_bytes=vmem_limit,
        ),
    )(logit_dst, logit_src_t, z_all, adj, params["b_gat"])

    # ---- Stage 2: readout + FF (tiny, fully resident) ----
    vmem = pl.BlockSpec(memory_space=pltpu.MemorySpace.VMEM)
    x_local = pl.pallas_call(
        _readout_ff_kernel,
        out_shape=jax.ShapeDtypeStruct((B, D), jnp.float32),
        in_specs=[vmem] * 11,
        out_specs=vmem,
    )(x_att_pad, seg, seg_t, inv_cnt, x_global,
      params["w_read"], params["w1g"], params["w1p"], params["b1"],
      params["w2"], params["b2"])

    return x_att_pad[:N], x_local


# ---------------------------------------------------------------------------
# Pure-JAX f32 reference (original semantics) for a correctness check.
# ---------------------------------------------------------------------------
def reference(x, adj, seg, cnt, xg, params):
    H = params["w_gat"].shape[0]
    N, D = x.shape
    acc = jnp.zeros((N, D), jnp.float32)
    for h in range(H):
        z = x @ params["w_gat"][h]
        a_src = jnp.sum(z * params["a_src"][h][None, :], -1, keepdims=True)
        a_dst = jnp.sum(z * params["a_dst"][h][None, :], -1, keepdims=True)
        e = a_dst + a_src.T
        e = jnp.where(e > 0, e, NEG_SLOPE * e)
        e = jnp.where(adj > 0, e, -1e30)
        e = e - jnp.max(e, -1, keepdims=True)
        p = jnp.exp(e) * adj
        alpha = p / jnp.sum(p, -1, keepdims=True)
        acc = acc + alpha @ z
    x_att = acc / H + params["b_gat"]
    mean = (seg @ x_att) / cnt
    t_glob = jnp.tanh(mean @ params["w_read"])
    coef = jax.nn.sigmoid(jnp.sum(x_att * (seg.T @ t_glob), -1, keepdims=True))
    pool = seg @ (coef * x_att)
    h1 = xg @ params["w1g"] + pool @ params["w1p"] + params["b1"]
    h1 = h1 * jax.nn.sigmoid(h1)
    x_local = h1 @ params["w2"] + params["b2"]
    return x_att, x_local


# ---------------------------------------------------------------------------
# Main
# ---------------------------------------------------------------------------
if __name__ == "__main__":
    D = 32        # input_dim
    GH = 16       # glob_hdim
    H = 4         # num_heads
    B = 2         # graphs in the batch
    NPG = 8       # nodes per graph
    N = B * NPG   # total nodes
    EPG = 12      # edges per graph

    key = jax.random.PRNGKey(0)
    keys = jax.random.split(key, 16)

    x = jax.random.normal(keys[0], (N, D), jnp.float32)
    batch = jnp.repeat(jnp.arange(B), NPG)
    x_global = jax.random.normal(keys[1], (B, GH), jnp.float32)

    # Random intra-graph edges.
    srcs, dsts = [], []
    for g in range(B):
        s = jax.random.randint(keys[2 + 2 * g], (EPG,), 0, NPG) + g * NPG
        d = jax.random.randint(keys[3 + 2 * g], (EPG,), 0, NPG) + g * NPG
        srcs.append(s)
        dsts.append(d)
    edge_index = jnp.stack([jnp.concatenate(srcs), jnp.concatenate(dsts)])

    def init(k, shape, scale=0.1):
        return scale * jax.random.normal(k, shape, jnp.float32)

    params = {
        "w_gat": init(keys[6], (H, D, D)),
        "a_src": init(keys[7], (H, D)),
        "a_dst": init(keys[8], (H, D)),
        "b_gat": init(keys[9], (1, D)),
        "w_read": init(keys[10], (D, D)),
        "w1g": init(keys[11], (GH, D)),
        "w1p": init(keys[12], (D, D)),
        "b1": init(keys[13], (1, D)),
        "w2": init(keys[14], (D, D)),
        "b2": init(keys[15], (1, D)),
    }

    x_att, x_local = hlocal_pool(x, edge_index, batch, x_global, params,
                                 num_graphs=B)
    jax.block_until_ready((x_att, x_local))

    # Verify against the pure-f32 reference.  Tolerance is 2e-2 because the
    # kernel feeds bf16 operands to the softmax-aggregation MXU matmul and
    # uses an approximate reciprocal for the edge-softmax normalisation.
    src, dst = edge_index[0], edge_index[1]
    adj_f32 = jnp.zeros((N, N), jnp.float32).at[dst, src].set(1.0)
    adj_f32 = jnp.maximum(adj_f32, jnp.eye(N, dtype=jnp.float32))
    seg_f32 = (batch[None, :] == jnp.arange(B)[:, None]).astype(jnp.float32)
    cnt = jnp.sum(seg_f32, -1, keepdims=True)
    ref_att, ref_local = reference(x, adj_f32, seg_f32, cnt, x_global, params)

    assert x_att.shape == (N, D) and x_local.shape == (B, D)
    assert jnp.allclose(x_att, ref_att, rtol=2e-2, atol=2e-2)
    assert jnp.allclose(x_local, ref_local, rtol=2e-2, atol=2e-2)

    print("KERNEL_OK")
</pallas_src>

<mosaic_0001>
module attributes {stable_mosaic.version = 11 : i64} {
  func.func @_readout_ff_kernel(%arg0: memref<16x32xf32, #tpu.memory_space<vmem>>, %arg1: memref<2x16xf32, #tpu.memory_space<vmem>>, %arg2: memref<16x2xf32, #tpu.memory_space<vmem>>, %arg3: memref<2x1xf32, #tpu.memory_space<vmem>>, %arg4: memref<2x16xf32, #tpu.memory_space<vmem>>, %arg5: memref<32x32xf32, #tpu.memory_space<vmem>>, %arg6: memref<16x32xf32, #tpu.memory_space<vmem>>, %arg7: memref<32x32xf32, #tpu.memory_space<vmem>>, %arg8: memref<1x32xf32, #tpu.memory_space<vmem>>, %arg9: memref<32x32xf32, #tpu.memory_space<vmem>>, %arg10: memref<1x32xf32, #tpu.memory_space<vmem>>, %arg11: memref<2x32xf32, #tpu.memory_space<vmem>>) attributes {dimension_semantics = [], scalar_prefetch = 0 : i64, scratch_operands = 0 : i64, tpu.core_type = #tpu.core_type<tc>} {
    %c0 = arith.constant 0 : index
    %c0_0 = arith.constant 0 : index
    %0 = vector.load %arg0[%c0, %c0_0] : memref<16x32xf32, #tpu.memory_space<vmem>>, vector<16x32xf32>
    %c0_1 = arith.constant 0 : index
    %c0_2 = arith.constant 0 : index
    %1 = vector.load %arg1[%c0_1, %c0_2] : memref<2x16xf32, #tpu.memory_space<vmem>>, vector<2x16xf32>
    %c0_3 = arith.constant 0 : index
    %c0_4 = arith.constant 0 : index
    %2 = vector.load %arg2[%c0_3, %c0_4] : memref<16x2xf32, #tpu.memory_space<vmem>>, vector<16x2xf32>
    %cst = arith.constant dense<0.000000e+00> : vector<2x32xf32>
    %3 = tpu.matmul %1, %0, %cst {dimension_numbers = #tpu.dot_dimension_numbers<[1], [0], [0], [1], [0, 0, 1, 1], [], []>} : vector<2x16xf32>, vector<16x32xf32>, vector<2x32xf32> -> vector<2x32xf32>
    %c0_5 = arith.constant 0 : index
    %c0_6 = arith.constant 0 : index
    %4 = vector.load %arg3[%c0_5, %c0_6] : memref<2x1xf32, #tpu.memory_space<vmem>>, vector<2x1xf32>
    %5 = vector.broadcast %4 : vector<2x1xf32> to vector<2x32xf32>
    %6 = arith.mulf %3, %5 : vector<2x32xf32>
    %c0_7 = arith.constant 0 : index
    %c0_8 = arith.constant 0 : index
    %7 = vector.load %arg5[%c0_7, %c0_8] : memref<32x32xf32, #tpu.memory_space<vmem>>, vector<32x32xf32>
    %cst_9 = arith.constant dense<0.000000e+00> : vector<2x32xf32>
    %8 = tpu.matmul %6, %7, %cst_9 {dimension_numbers = #tpu.dot_dimension_numbers<[1], [0], [0], [1], [0, 0, 1, 1], [], []>} : vector<2x32xf32>, vector<32x32xf32>, vector<2x32xf32> -> vector<2x32xf32>
    %9 = math.tanh %8 : vector<2x32xf32>
    %cst_10 = arith.constant dense<0.000000e+00> : vector<16x32xf32>
    %10 = tpu.matmul %2, %9, %cst_10 {dimension_numbers = #tpu.dot_dimension_numbers<[1], [0], [0], [1], [0, 0, 1, 1], [], []>} : vector<16x2xf32>, vector<2x32xf32>, vector<16x32xf32> -> vector<16x32xf32>
    %11 = arith.mulf %0, %10 : vector<16x32xf32>
    %cst_11 = arith.constant dense<0.000000e+00> : vector<16xf32>
    %12 = vector.multi_reduction <add>, %11, %cst_11 [1] : vector<16x32xf32> to vector<16xf32>
    %13 = vector.shape_cast %12 : vector<16xf32> to vector<16x1xf32>
    %14 = arith.negf %13 : vector<16x1xf32>
    %15 = math.exp %14 : vector<16x1xf32>
    %cst_12 = arith.constant 1.000000e+00 : f32
    %16 = vector.broadcast %cst_12 : f32 to vector<16x1xf32>
    %17 = arith.addf %16, %15 : vector<16x1xf32>
    %18 = arith.divf %16, %17 : vector<16x1xf32>
    %19 = vector.broadcast %18 : vector<16x1xf32> to vector<16x32xf32>
    %20 = arith.mulf %19, %0 : vector<16x32xf32>
    %cst_13 = arith.constant dense<0.000000e+00> : vector<2x32xf32>
    %21 = tpu.matmul %1, %20, %cst_13 {dimension_numbers = #tpu.dot_dimension_numbers<[1], [0], [0], [1], [0, 0, 1, 1], [], []>} : vector<2x16xf32>, vector<16x32xf32>, vector<2x32xf32> -> vector<2x32xf32>
    %c0_14 = arith.constant 0 : index
    %c0_15 = arith.constant 0 : index
    %22 = vector.load %arg4[%c0_14, %c0_15] : memref<2x16xf32, #tpu.memory_space<vmem>>, vector<2x16xf32>
    %c0_16 = arith.constant 0 : index
    %c0_17 = arith.constant 0 : index
    %23 = vector.load %arg6[%c0_16, %c0_17] : memref<16x32xf32, #tpu.memory_space<vmem>>, vector<16x32xf32>
    %cst_18 = arith.constant dense<0.000000e+00> : vector<2x32xf32>
    %24 = tpu.matmul %22, %23, %cst_18 {dimension_numbers = #tpu.dot_dimension_numbers<[1], [0], [0], [1], [0, 0, 1, 1], [], []>} : vector<2x16xf32>, vector<16x32xf32>, vector<2x32xf32> -> vector<2x32xf32>
    %c0_19 = arith.constant 0 : index
    %c0_20 = arith.constant 0 : index
    %25 = vector.load %arg7[%c0_19, %c0_20] : memref<32x32xf32, #tpu.memory_space<vmem>>, vector<32x32xf32>
    %cst_21 = arith.constant dense<0.000000e+00> : vector<2x32xf32>
    %26 = tpu.matmul %21, %25, %cst_21 {dimension_numbers = #tpu.dot_dimension_numbers<[1], [0], [0], [1], [0, 0, 1, 1], [], []>} : vector<2x32xf32>, vector<32x32xf32>, vector<2x32xf32> -> vector<2x32xf32>
    %27 = arith.addf %24, %26 : vector<2x32xf32>
    %c0_22 = arith.constant 0 : index
    %c0_23 = arith.constant 0 : index
    %28 = vector.load %arg8[%c0_22, %c0_23] : memref<1x32xf32, #tpu.memory_space<vmem>>, vector<1x32xf32>
    %29 = vector.broadcast %28 : vector<1x32xf32> to vector<2x32xf32>
    %30 = arith.addf %27, %29 : vector<2x32xf32>
    %31 = arith.negf %30 : vector<2x32xf32>
    %32 = math.exp %31 : vector<2x32xf32>
    %cst_24 = arith.constant 1.000000e+00 : f32
    %33 = vector.broadcast %cst_24 : f32 to vector<2x32xf32>
    %34 = arith.addf %33, %32 : vector<2x32xf32>
    %35 = arith.divf %33, %34 : vector<2x32xf32>
    %36 = arith.mulf %30, %35 : vector<2x32xf32>
    %c0_25 = arith.constant 0 : index
    %c0_26 = arith.constant 0 : index
    %37 = vector.load %arg9[%c0_25, %c0_26] : memref<32x32xf32, #tpu.memory_space<vmem>>, vector<32x32xf32>
    %cst_27 = arith.constant dense<0.000000e+00> : vector<2x32xf32>
    %38 = tpu.matmul %36, %37, %cst_27 {dimension_numbers = #tpu.dot_dimension_numbers<[1], [0], [0], [1], [0, 0, 1, 1], [], []>} : vector<2x32xf32>, vector<32x32xf32>, vector<2x32xf32> -> vector<2x32xf32>
    %c0_28 = arith.constant 0 : index
    %c0_29 = arith.constant 0 : index
    %39 = vector.load %arg10[%c0_28, %c0_29] : memref<1x32xf32, #tpu.memory_space<vmem>>, vector<1x32xf32>
    %40 = vector.broadcast %39 : vector<1x32xf32> to vector<2x32xf32>
    %41 = arith.addf %38, %40 : vector<2x32xf32>
    %c0_30 = arith.constant 0 : index
    %c0_31 = arith.constant 0 : index
    %42 = vector.load %arg11[%c0_30, %c0_31] : memref<2x32xf32, #tpu.memory_space<vmem>>, vector<2x32xf32>
    tpu.vector_store %arg11[%c0_30, %c0_31], %41 {strides = array<i32>} : memref<2x32xf32, #tpu.memory_space<vmem>>, vector<2x32xf32>,
    return
  }
}

module attributes {stable_mosaic.version = 11 : i64} {
  func.func @_gat_kernel(%arg0: i32, %arg1: i32, %arg2: memref<16x4xf32, #tpu.memory_space<vmem>>, %arg3: memref<4x16xf32, #tpu.memory_space<vmem>>, %arg4: memref<16x128xbf16, #tpu.memory_space<vmem>>, %arg5: memref<16x16xbf16, #tpu.memory_space<vmem>>, %arg6: memref<1x32xf32, #tpu.memory_space<vmem>>, %arg7: memref<16x32xf32, #tpu.memory_space<vmem>>, %arg8: memref<4x16x1xf32, #tpu.memory_space<vmem>>, %arg9: memref<4x16x1xf32, #tpu.memory_space<vmem>>, %arg10: memref<4x16x32xf32, #tpu.memory_space<vmem>>) attributes {dimension_semantics = [#tpu.dimension_semantics<parallel>, #tpu.dimension_semantics<arbitrary>], iteration_bounds = array<i64: 1, 1>, scalar_prefetch = 0 : i64, scratch_operands = 3 : i64, tpu.core_type = #tpu.core_type<tc>, window_params = [{transform_indices = @transform_0, window_bounds = array<i64: 16, 4>}, {transform_indices = @transform_1, window_bounds = array<i64: 4, 16>}, {transform_indices = @transform_2, window_bounds = array<i64: 16, 128>}, {transform_indices = @transform_3, window_bounds = array<i64: 16, 16>}, {pipeline_mode = #tpu.pipeline_mode<synchronous>, transform_indices = @transform_4, window_bounds = array<i64: 1, 32>}, {transform_indices = @transform_5, window_bounds = array<i64: 16, 32>}]} {
    %c0_i32 = arith.constant 0 : i32
    %0 = arith.cmpi eq, %arg1, %c0_i32 : i32
    %1 = arith.extui %0 : i1 to i32
    %c0_i32_0 = arith.constant 0 : i32
    %2 = arith.cmpi ne, %1, %c0_i32_0 : i32
    scf.if %2 {
      %cst_103 = arith.constant -1.000000e+09 : f32
      %192 = vector.broadcast %cst_103 : f32 to vector<4x16x1xf32>
      %c0_104 = arith.constant 0 : index
      %c0_105 = arith.constant 0 : index
      %c0_106 = arith.constant 0 : index
      %193 = vector.load %arg8[%c0_104, %c0_105, %c0_106] : memref<4x16x1xf32, #tpu.memory_space<vmem>>, vector<4x16x1xf32>
      tpu.vector_store %arg8[%c0_104, %c0_105, %c0_106], %192 {strides = array<i32>} : memref<4x16x1xf32, #tpu.memory_space<vmem>>, vector<4x16x1xf32>,
      %cst_107 = arith.constant 0.000000e+00 : f32
      %194 = vector.broadcast %cst_107 : f32 to vector<4x16x1xf32>
      %c0_108 = arith.constant 0 : index
      %c0_109 = arith.constant 0 : index
      %c0_110 = arith.constant 0 : index
      %195 = vector.load %arg9[%c0_108, %c0_109, %c0_110] : memref<4x16x1xf32, #tpu.memory_space<vmem>>, vector<4x16x1xf32>
      tpu.vector_store %arg9[%c0_108, %c0_109, %c0_110], %194 {strides = array<i32>} : memref<4x16x1xf32, #tpu.memory_space<vmem>>, vector<4x16x1xf32>,
      %cst_111 = arith.constant 0.000000e+00 : f32
      %196 = vector.broadcast %cst_111 : f32 to vector<4x16x32xf32>
      %c0_112 = arith.constant 0 : index
      %c0_113 = arith.constant 0 : index
      %c0_114 = arith.constant 0 : index
      %197 = vector.load %arg10[%c0_112, %c0_113, %c0_114] : memref<4x16x32xf32, #tpu.memory_space<vmem>>, vector<4x16x32xf32>
      tpu.vector_store %arg10[%c0_112, %c0_113, %c0_114], %196 {strides = array<i32>} : memref<4x16x32xf32, #tpu.memory_space<vmem>>, vector<4x16x32xf32>,
    } else {
    }
    %c0 = arith.constant 0 : index
    %c0_1 = arith.constant 0 : index
    %3 = vector.load %arg5[%c0, %c0_1] : memref<16x16xbf16, #tpu.memory_space<vmem>>, vector<16x16xbf16>
    %cst = arith.constant 0.000000e+00 : bf16
    %4 = vector.broadcast %cst : bf16 to vector<16x16xbf16>
    %5 = arith.cmpf ogt, %3, %4 : vector<16x16xbf16>
    %c0_2 = arith.constant 0 : index
    %c0_3 = arith.constant 0 : index
    %6 = vector.load %arg4[%c0_2, %c0_3] : memref<16x128xbf16, #tpu.memory_space<vmem>>, vector<16x128xbf16>
    %c0_4 = arith.constant 0 : index
    %c0_5 = arith.constant 0 : index
    %7 = vector.load %arg2[%c0_4, %c0_5] : memref<16x4xf32, #tpu.memory_space<vmem>>, vector<16x4xf32>
    %c0_6 = arith.constant 0 : index
    %c0_7 = arith.constant 0 : index
    %8 = vector.load %arg3[%c0_6, %c0_7] : memref<4x16xf32, #tpu.memory_space<vmem>>, vector<4x16xf32>
    %9 = vector.extract_strided_slice %7 {offsets = [0, 0], sizes = [16, 1], strides = [1, 1]} : vector<16x4xf32> to vector<16x1xf32>
    %10 = vector.extract_strided_slice %8 {offsets = [0, 0], sizes = [1, 16], strides = [1, 1]} : vector<4x16xf32> to vector<1x16xf32>
    %11 = vector.broadcast %9 : vector<16x1xf32> to vector<16x16xf32>
    %12 = vector.broadcast %10 : vector<1x16xf32> to vector<16x16xf32>
    %13 = arith.addf %11, %12 : vector<16x16xf32>
    %cst_8 = arith.constant 0.000000e+00 : f32
    %14 = vector.broadcast %cst_8 : f32 to vector<16x16xf32>
    %15 = arith.cmpf ogt, %13, %14 : vector<16x16xf32>
    %cst_9 = arith.constant 2.000000e-01 : f32
    %16 = vector.broadcast %cst_9 : f32 to vector<16x16xf32>
    %17 = arith.mulf %16, %13 : vector<16x16xf32>
    %18 = arith.select %15, %13, %17 : vector<16x16xi1>, vector<16x16xf32>
    %cst_10 = arith.constant -1.000000e+30 : f32
    %19 = vector.broadcast %cst_10 : f32 to vector<16x16xf32>
    %20 = arith.select %5, %18, %19 : vector<16x16xi1>, vector<16x16xf32>
    %c0_11 = arith.constant 0 : index
    %c0_12 = arith.constant 0 : index
    %c0_13 = arith.constant 0 : index
    %21 = vector.load %arg8[%c0_11, %c0_12, %c0_13] : memref<4x16x1xf32, #tpu.memory_space<vmem>>, vector<1x16x1xf32>
    %22 = vector.shape_cast %21 : vector<1x16x1xf32> to vector<16x1xf32>
    %cst_14 = arith.constant dense<0xFF800000> : vector<16xf32>
    %23 = vector.multi_reduction <maximumf>, %20, %cst_14 [1] : vector<16x16xf32> to vector<16xf32>
    %24 = vector.shape_cast %23 : vector<16xf32> to vector<16x1xf32>
    %25 = arith.maximumf %22, %24 : vector<16x1xf32>
    %26 = arith.subf %22, %25 : vector<16x1xf32>
    %27 = math.exp %26 : vector<16x1xf32>
    %28 = vector.broadcast %25 : vector<16x1xf32> to vector<16x16xf32>
    %29 = arith.subf %20, %28 : vector<16x16xf32>
    %30 = math.exp %29 : vector<16x16xf32>
    %c0_15 = arith.constant 0 : index
    %c0_16 = arith.constant 0 : index
    %c0_17 = arith.constant 0 : index
    %31 = vector.load %arg9[%c0_15, %c0_16, %c0_17] : memref<4x16x1xf32, #tpu.memory_space<vmem>>, vector<1x16x1xf32>
    %32 = vector.shape_cast %31 : vector<1x16x1xf32> to vector<16x1xf32>
    %33 = arith.mulf %27, %32 : vector<16x1xf32>
    %cst_18 = arith.constant dense<0.000000e+00> : vector<16xf32>
    %34 = vector.multi_reduction <add>, %30, %cst_18 [1] : vector<16x16xf32> to vector<16xf32>
    %35 = vector.shape_cast %34 : vector<16xf32> to vector<16x1xf32>
    %36 = arith.addf %33, %35 : vector<16x1xf32>
    %c0_19 = arith.constant 0 : index
    %c0_20 = arith.constant 0 : index
    %c0_21 = arith.constant 0 : index
    %37 = vector.load %arg9[%c0_19, %c0_20, %c0_21] : memref<4x16x1xf32, #tpu.memory_space<vmem>>, vector<1x16x1xf32>
    %38 = vector.shape_cast %37 : vector<1x16x1xf32> to vector<16x1xf32>
    %39 = vector.shape_cast %36 : vector<16x1xf32> to vector<1x16x1xf32>
    tpu.vector_store %arg9[%c0_19, %c0_20, %c0_21], %39 {strides = array<i32>} : memref<4x16x1xf32, #tpu.memory_space<vmem>>, vector<1x16x1xf32>,
    %c0_22 = arith.constant 0 : index
    %c0_23 = arith.constant 0 : index
    %c0_24 = arith.constant 0 : index
    %40 = vector.load %arg10[%c0_22, %c0_23, %c0_24] : memref<4x16x32xf32, #tpu.memory_space<vmem>>, vector<1x16x32xf32>
    %41 = vector.shape_cast %40 : vector<1x16x32xf32> to vector<16x32xf32>
    %42 = vector.broadcast %27 : vector<16x1xf32> to vector<16x32xf32>
    %43 = arith.mulf %42, %41 : vector<16x32xf32>
    %44 = arith.truncf %30 : vector<16x16xf32> to vector<16x16xbf16>
    %45 = vector.extract_strided_slice %6 {offsets = [0, 0], sizes = [16, 32], strides = [1, 1]} : vector<16x128xbf16> to vector<16x32xbf16>
    %cst_25 = arith.constant dense<0.000000e+00> : vector<16x32xf32>
    %46 = tpu.matmul %44, %45, %cst_25 {dimension_numbers = #tpu.dot_dimension_numbers<[1], [0], [0], [1], [0, 0, 1, 1], [], []>} : vector<16x16xbf16>, vector<16x32xbf16>, vector<16x32xf32> -> vector<16x32xf32>
    %47 = arith.addf %43, %46 : vector<16x32xf32>
    %c0_26 = arith.constant 0 : index
    %c0_27 = arith.constant 0 : index
    %c0_28 = arith.constant 0 : index
    %48 = vector.load %arg10[%c0_26, %c0_27, %c0_28] : memref<4x16x32xf32, #tpu.memory_space<vmem>>, vector<1x16x32xf32>
    %49 = vector.shape_cast %48 : vector<1x16x32xf32> to vector<16x32xf32>
    %50 = vector.shape_cast %47 : vector<16x32xf32> to vector<1x16x32xf32>
    tpu.vector_store %arg10[%c0_26, %c0_27, %c0_28], %50 {strides = array<i32>} : memref<4x16x32xf32, #tpu.memory_space<vmem>>, vector<1x16x32xf32>,
    %c0_29 = arith.constant 0 : index
    %c0_30 = arith.constant 0 : index
    %c0_31 = arith.constant 0 : index
    %51 = vector.load %arg8[%c0_29, %c0_30, %c0_31] : memref<4x16x1xf32, #tpu.memory_space<vmem>>, vector<1x16x1xf32>
    %52 = vector.shape_cast %51 : vector<1x16x1xf32> to vector<16x1xf32>
    %53 = vector.shape_cast %25 : vector<16x1xf32> to vector<1x16x1xf32>
    tpu.vector_store %arg8[%c0_29, %c0_30, %c0_31], %53 {strides = array<i32>} : memref<4x16x1xf32, #tpu.memory_space<vmem>>, vector<1x16x1xf32>,
    %54 = vector.extract_strided_slice %7 {offsets = [0, 1], sizes = [16, 1], strides = [1, 1]} : vector<16x4xf32> to vector<16x1xf32>
    %55 = vector.extract_strided_slice %8 {offsets = [1, 0], sizes = [1, 16], strides = [1, 1]} : vector<4x16xf32> to vector<1x16xf32>
    %56 = vector.broadcast %54 : vector<16x1xf32> to vector<16x16xf32>
    %57 = vector.broadcast %55 : vector<1x16xf32> to vector<16x16xf32>
    %58 = arith.addf %56, %57 : vector<16x16xf32>
    %cst_32 = arith.constant 0.000000e+00 : f32
    %59 = vector.broadcast %cst_32 : f32 to vector<16x16xf32>
    %60 = arith.cmpf ogt, %58, %59 : vector<16x16xf32>
    %cst_33 = arith.constant 2.000000e-01 : f32
    %61 = vector.broadcast %cst_33 : f32 to vector<16x16xf32>
    %62 = arith.mulf %61, %58 : vector<16x16xf32>
    %63 = arith.select %60, %58, %62 : vector<16x16xi1>, vector<16x16xf32>
    %cst_34 = arith.constant -1.000000e+30 : f32
    %64 = vector.broadcast %cst_34 : f32 to vector<16x16xf32>
    %65 = arith.select %5, %63, %64 : vector<16x16xi1>, vector<16x16xf32>
    %c1 = arith.constant 1 : index
    %c0_35 = arith.constant 0 : index
    %c0_36 = arith.constant 0 : index
    %66 = vector.load %arg8[%c1, %c0_35, %c0_36] : memref<4x16x1xf32, #tpu.memory_space<vmem>>, vector<1x16x1xf32>
    %67 = vector.shape_cast %66 : vector<1x16x1xf32> to vector<16x1xf32>
    %cst_37 = arith.constant dense<0xFF800000> : vector<16xf32>
    %68 = vector.multi_reduction <maximumf>, %65, %cst_37 [1] : vector<16x16xf32> to vector<16xf32>
    %69 = vector.shape_cast %68 : vector<16xf32> to vector<16x1xf32>
    %70 = arith.maximumf %67, %69 : vector<16x1xf32>
    %71 = arith.subf %67, %70 : vector<16x1xf32>
    %72 = math.exp %71 : vector<16x1xf32>
    %73 = vector.broadcast %70 : vector<16x1xf32> to vector<16x16xf32>
    %74 = arith.subf %65, %73 : vector<16x16xf32>
    %75 = math.exp %74 : vector<16x16xf32>
    %c1_38 = arith.constant 1 : index
    %c0_39 = arith.constant 0 : index
    %c0_40 = arith.constant 0 : index
    %76 = vector.load %arg9[%c1_38, %c0_39, %c0_40] : memref<4x16x1xf32, #tpu.memory_space<vmem>>, vector<1x16x1xf32>
    %77 = vector.shape_cast %76 : vector<1x16x1xf32> to vector<16x1xf32>
    %78 = arith.mulf %72, %77 : vector<16x1xf32>
    %cst_41 = arith.constant dense<0.000000e+00> : vector<16xf32>
    %79 = vector.multi_reduction <add>, %75, %cst_41 [1] : vector<16x16xf32> to vector<16xf32>
    %80 = vector.shape_cast %79 : vector<16xf32> to vector<16x1xf32>
    %81 = arith.addf %78, %80 : vector<16x1xf32>
    %c1_42 = arith.constant 1 : index
    %c0_43 = arith.constant 0 : index
    %c0_44 = arith.constant 0 : index
    %82 = vector.load %arg9[%c1_42, %c0_43, %c0_44] : memref<4x16x1xf32, #tpu.memory_space<vmem>>, vector<1x16x1xf32>
    %83 = vector.shape_cast %82 : vector<1x16x1xf32> to vector<16x1xf32>
    %84 = vector.shape_cast %81 : vector<16x1xf32> to vector<1x16x1xf32>
    tpu.vector_store %arg9[%c1_42, %c0_43, %c0_44], %84 {strides = array<i32>} : memref<4x16x1xf32, #tpu.memory_space<vmem>>, vector<1x16x1xf32>,
    %c1_45 = arith.constant 1 : index
    %c0_46 = arith.constant 0 : index
    %c0_47 = arith.constant 0 : index
    %85 = vector.load %arg10[%c1_45, %c0_46, %c0_47] : memref<4x16x32xf32, #tpu.memory_space<vmem>>, vector<1x16x32xf32>
    %86 = vector.shape_cast %85 : vector<1x16x32xf32> to vector<16x32xf32>
    %87 = vector.broadcast %72 : vector<16x1xf32> to vector<16x32xf32>
    %88 = arith.mulf %87, %86 : vector<16x32xf32>
    %89 = arith.truncf %75 : vector<16x16xf32> to vector<16x16xbf16>
    %90 = vector.extract_strided_slice %6 {offsets = [0, 32], sizes = [16, 32], strides = [1, 1]} : vector<16x128xbf16> to vector<16x32xbf16>
    %cst_48 = arith.constant dense<0.000000e+00> : vector<16x32xf32>
    %91 = tpu.matmul %89, %90, %cst_48 {dimension_numbers = #tpu.dot_dimension_numbers<[1], [0], [0], [1], [0, 0, 1, 1], [], []>} : vector<16x16xbf16>, vector<16x32xbf16>, vector<16x32xf32> -> vector<16x32xf32>
    %92 = arith.addf %88, %91 : vector<16x32xf32>
    %c1_49 = arith.constant 1 : index
    %c0_50 = arith.constant 0 : index
    %c0_51 = arith.constant 0 : index
    %93 = vector.load %arg10[%c1_49, %c0_50, %c0_51] : memref<4x16x32xf32, #tpu.memory_space<vmem>>, vector<1x16x32xf32>
    %94 = vector.shape_cast %93 : vector<1x16x32xf32> to vector<16x32xf32>
    %95 = vector.shape_cast %92 : vector<16x32xf32> to vector<1x16x32xf32>
    tpu.vector_store %arg10[%c1_49, %c0_50, %c0_51], %95 {strides = array<i32>} : memref<4x16x32xf32, #tpu.memory_space<vmem>>, vector<1x16x32xf32>,
    %c1_52 = arith.constant 1 : index
    %c0_53 = arith.constant 0 : index
    %c0_54 = arith.constant 0 : index
    %96 = vector.load %arg8[%c1_52, %c0_53, %c0_54] : memref<4x16x1xf32, #tpu.memory_space<vmem>>, vector<1x16x1xf32>
    %97 = vector.shape_cast %96 : vector<1x16x1xf32> to vector<16x1xf32>
    %98 = vector.shape_cast %70 : vector<16x1xf32> to vector<1x16x1xf32>
    tpu.vector_store %arg8[%c1_52, %c0_53, %c0_54], %98 {strides = array<i32>} : memref<4x16x1xf32, #tpu.memory_space<vmem>>, vector<1x16x1xf32>,
    %99 = vector.extract_strided_slice %7 {offsets = [0, 2], sizes = [16, 1], strides = [1, 1]} : vector<16x4xf32> to vector<16x1xf32>
    %100 = vector.extract_strided_slice %8 {offsets = [2, 0], sizes = [1, 16], strides = [1, 1]} : vector<4x16xf32> to vector<1x16xf32>
    %101 = vector.broadcast %99 : vector<16x1xf32> to vector<16x16xf32>
    %102 = vector.broadcast %100 : vector<1x16xf32> to vector<16x16xf32>
    %103 = arith.addf %101, %102 : vector<16x16xf32>
    %cst_55 = arith.constant 0.000000e+00 : f32
    %104 = vector.broadcast %cst_55 : f32 to vector<16x16xf32>
    %105 = arith.cmpf ogt, %103, %104 : vector<16x16xf32>
    %cst_56 = arith.constant 2.000000e-01 : f32
    %106 = vector.broadcast %cst_56 : f32 to vector<16x16xf32>
    %107 = arith.mulf %106, %103 : vector<16x16xf32>
    %108 = arith.select %105, %103, %107 : vector<16x16xi1>, vector<16x16xf32>
    %cst_57 = arith.constant -1.000000e+30 : f32
    %109 = vector.broadcast %cst_57 : f32 to vector<16x16xf32>
    %110 = arith.select %5, %108, %109 : vector<16x16xi1>, vector<16x16xf32>
    %c2 = arith.constant 2 : index
    %c0_58 = arith.constant 0 : index
    %c0_59 = arith.constant 0 : index
    %111 = vector.load %arg8[%c2, %c0_58, %c0_59] : memref<4x16x1xf32, #tpu.memory_space<vmem>>, vector<1x16x1xf32>
    %112 = vector.shape_cast %111 : vector<1x16x1xf32> to vector<16x1xf32>
    %cst_60 = arith.constant dense<0xFF800000> : vector<16xf32>
    %113 = vector.multi_reduction <maximumf>, %110, %cst_60 [1] : vector<16x16xf32> to vector<16xf32>
    %114 = vector.shape_cast %113 : vector<16xf32> to vector<16x1xf32>
    %115 = arith.maximumf %112, %114 : vector<16x1xf32>
    %116 = arith.subf %112, %115 : vector<16x1xf32>
    %117 = math.exp %116 : vector<16x1xf32>
    %118 = vector.broadcast %115 : vector<16x1xf32> to vector<16x16xf32>
    %119 = arith.subf %110, %118 : vector<16x16xf32>
    %120 = math.exp %119 : vector<16x16xf32>
    %c2_61 = arith.constant 2 : index
    %c0_62 = arith.constant 0 : index
    %c0_63 = arith.constant 0 : index
    %121 = vector.load %arg9[%c2_61, %c0_62, %c0_63] : memref<4x16x1xf32, #tpu.memory_space<vmem>>, vector<1x16x1xf32>
    %122 = vector.shape_cast %121 : vector<1x16x1xf32> to vector<16x1xf32>
    %123 = arith.mulf %117, %122 : vector<16x1xf32>
    %cst_64 = arith.constant dense<0.000000e+00> : vector<16xf32>
    %124 = vector.multi_reduction <add>, %120, %cst_64 [1] : vector<16x16xf32> to vector<16xf32>
    %125 = vector.shape_cast %124 : vector<16xf32> to vector<16x1xf32>
    %126 = arith.addf %123, %125 : vector<16x1xf32>
    %c2_65 = arith.constant 2 : index
    %c0_66 = arith.constant 0 : index
    %c0_67 = arith.constant 0 : index
    %127 = vector.load %arg9[%c2_65, %c0_66, %c0_67] : memref<4x16x1xf32, #tpu.memory_space<vmem>>, vector<1x16x1xf32>
    %128 = vector.shape_cast %127 : vector<1x16x1xf32> to vector<16x1xf32>
    %129 = vector.shape_cast %126 : vector<16x1xf32> to vector<1x16x1xf32>
    tpu.vector_store %arg9[%c2_65, %c0_66, %c0_67], %129 {strides = array<i32>} : memref<4x16x1xf32, #tpu.memory_space<vmem>>, vector<1x16x1xf32>,
    %c2_68 = arith.constant 2 : index
    %c0_69 = arith.constant 0 : index
    %c0_70 = arith.constant 0 : index
    %130 = vector.load %arg10[%c2_68, %c0_69, %c0_70] : memref<4x16x32xf32, #tpu.memory_space<vmem>>, vector<1x16x32xf32>
    %131 = vector.shape_cast %130 : vector<1x16x32xf32> to vector<16x32xf32>
    %132 = vector.broadcast %117 : vector<16x1xf32> to vector<16x32xf32>
    %133 = arith.mulf %132, %131 : vector<16x32xf32>
    %134 = arith.truncf %120 : vector<16x16xf32> to vector<16x16xbf16>
    %135 = vector.extract_strided_slice %6 {offsets = [0, 64], sizes = [16, 32], strides = [1, 1]} : vector<16x128xbf16> to vector<16x32xbf16>
    %cst_71 = arith.constant dense<0.000000e+00> : vector<16x32xf32>
    %136 = tpu.matmul %134, %135, %cst_71 {dimension_numbers = #tpu.dot_dimension_numbers<[1], [0], [0], [1], [0, 0, 1, 1], [], []>} : vector<16x16xbf16>, vector<16x32xbf16>, vector<16x32xf32> -> vector<16x32xf32>
    %137 = arith.addf %133, %136 : vector<16x32xf32>
    %c2_72 = arith.constant 2 : index
    %c0_73 = arith.constant 0 : index
    %c0_74 = arith.constant 0 : index
    %138 = vector.load %arg10[%c2_72, %c0_73, %c0_74] : memref<4x16x32xf32, #tpu.memory_space<vmem>>, vector<1x16x32xf32>
    %139 = vector.shape_cast %138 : vector<1x16x32xf32> to vector<16x32xf32>
    %140 = vector.shape_cast %137 : vector<16x32xf32> to vector<1x16x32xf32>
    tpu.vector_store %arg10[%c2_72, %c0_73, %c0_74], %140 {strides = array<i32>} : memref<4x16x32xf32, #tpu.memory_space<vmem>>, vector<1x16x32xf32>,
    %c2_75 = arith.constant 2 : index
    %c0_76 = arith.constant 0 : index
    %c0_77 = arith.constant 0 : index
    %141 = vector.load %arg8[%c2_75, %c0_76, %c0_77] : memref<4x16x1xf32, #tpu.memory_space<vmem>>, vector<1x16x1xf32>
    %142 = vector.shape_cast %141 : vector<1x16x1xf32> to vector<16x1xf32>
    %143 = vector.shape_cast %115 : vector<16x1xf32> to vector<1x16x1xf32>
    tpu.vector_store %arg8[%c2_75, %c0_76, %c0_77], %143 {strides = array<i32>} : memref<4x16x1xf32, #tpu.memory_space<vmem>>, vector<1x16x1xf32>,
    %144 = vector.extract_strided_slice %7 {offsets = [0, 3], sizes = [16, 1], strides = [1, 1]} : vector<16x4xf32> to vector<16x1xf32>
    %145 = vector.extract_strided_slice %8 {offsets = [3, 0], sizes = [1, 16], strides = [1, 1]} : vector<4x16xf32> to vector<1x16xf32>
    %146 = vector.broadcast %144 : vector<16x1xf32> to vector<16x16xf32>
    %147 = vector.broadcast %145 : vector<1x16xf32> to vector<16x16xf32>
    %148 = arith.addf %146, %147 : vector<16x16xf32>
    %cst_78 = arith.constant 0.000000e+00 : f32
    %149 = vector.broadcast %cst_78 : f32 to vector<16x16xf32>
    %150 = arith.cmpf ogt, %148, %149 : vector<16x16xf32>
    %cst_79 = arith.constant 2.000000e-01 : f32
    %151 = vector.broadcast %cst_79 : f32 to vector<16x16xf32>
    %152 = arith.mulf %151, %148 : vector<16x16xf32>
    %153 = arith.select %150, %148, %152 : vector<16x16xi1>, vector<16x16xf32>
    %cst_80 = arith.constant -1.000000e+30 : f32
    %154 = vector.broadcast %cst_80 : f32 to vector<16x16xf32>
    %155 = arith.select %5, %153, %154 : vector<16x16xi1>, vector<16x16xf32>
    %c3 = arith.constant 3 : index
    %c0_81 = arith.constant 0 : index
    %c0_82 = arith.constant 0 : index
    %156 = vector.load %arg8[%c3, %c0_81, %c0_82] : memref<4x16x1xf32, #tpu.memory_space<vmem>>, vector<1x16x1xf32>
    %157 = vector.shape_cast %156 : vector<1x16x1xf32> to vector<16x1xf32>
    %cst_83 = arith.constant dense<0xFF800000> : vector<16xf32>
    %158 = vector.multi_reduction <maximumf>, %155, %cst_83 [1] : vector<16x16xf32> to vector<16xf32>
    %159 = vector.shape_cast %158 : vector<16xf32> to vector<16x1xf32>
    %160 = arith.maximumf %157, %159 : vector<16x1xf32>
    %161 = arith.subf %157, %160 : vector<16x1xf32>
    %162 = math.exp %161 : vector<16x1xf32>
    %163 = vector.broadcast %160 : vector<16x1xf32> to vector<16x16xf32>
    %164 = arith.subf %155, %163 : vector<16x16xf32>
    %165 = math.exp %164 : vector<16x16xf32>
    %c3_84 = arith.constant 3 : index
    %c0_85 = arith.constant 0 : index
    %c0_86 = arith.constant 0 : index
    %166 = vector.load %arg9[%c3_84, %c0_85, %c0_86] : memref<4x16x1xf32, #tpu.memory_space<vmem>>, vector<1x16x1xf32>
    %167 = vector.shape_cast %166 : vector<1x16x1xf32> to vector<16x1xf32>
    %168 = arith.mulf %162, %167 : vector<16x1xf32>
    %cst_87 = arith.constant dense<0.000000e+00> : vector<16xf32>
    %169 = vector.multi_reduction <add>, %165, %cst_87 [1] : vector<16x16xf32> to vector<16xf32>
    %170 = vector.shape_cast %169 : vector<16xf32> to vector<16x1xf32>
    %171 = arith.addf %168, %170 : vector<16x1xf32>
    %c3_88 = arith.constant 3 : index
    %c0_89 = arith.constant 0 : index
    %c0_90 = arith.constant 0 : index
    %172 = vector.load %arg9[%c3_88, %c0_89, %c0_90] : memref<4x16x1xf32, #tpu.memory_space<vmem>>, vector<1x16x1xf32>
    %173 = vector.shape_cast %172 : vector<1x16x1xf32> to vector<16x1xf32>
    %174 = vector.shape_cast %171 : vector<16x1xf32> to vector<1x16x1xf32>
    tpu.vector_store %arg9[%c3_88, %c0_89, %c0_90], %174 {strides = array<i32>} : memref<4x16x1xf32, #tpu.memory_space<vmem>>, vector<1x16x1xf32>,
    %c3_91 = arith.constant 3 : index
    %c0_92 = arith.constant 0 : index
    %c0_93 = arith.constant 0 : index
    %175 = vector.load %arg10[%c3_91, %c0_92, %c0_93] : memref<4x16x32xf32, #tpu.memory_space<vmem>>, vector<1x16x32xf32>
    %176 = vector.shape_cast %175 : vector<1x16x32xf32> to vector<16x32xf32>
    %177 = vector.broadcast %162 : vector<16x1xf32> to vector<16x32xf32>
    %178 = arith.mulf %177, %176 : vector<16x32xf32>
    %179 = arith.truncf %165 : vector<16x16xf32> to vector<16x16xbf16>
    %180 = vector.extract_strided_slice %6 {offsets = [0, 96], sizes = [16, 32], strides = [1, 1]} : vector<16x128xbf16> to vector<16x32xbf16>
    %cst_94 = arith.constant dense<0.000000e+00> : vector<16x32xf32>
    %181 = tpu.matmul %179, %180, %cst_94 {dimension_numbers = #tpu.dot_dimension_numbers<[1], [0], [0], [1], [0, 0, 1, 1], [], []>} : vector<16x16xbf16>, vector<16x32xbf16>, vector<16x32xf32> -> vector<16x32xf32>
    %182 = arith.addf %178, %181 : vector<16x32xf32>
    %c3_95 = arith.constant 3 : index
    %c0_96 = arith.constant 0 : index
    %c0_97 = arith.constant 0 : index
    %183 = vector.load %arg10[%c3_95, %c0_96, %c0_97] : memref<4x16x32xf32, #tpu.memory_space<vmem>>, vector<1x16x32xf32>
    %184 = vector.shape_cast %183 : vector<1x16x32xf32> to vector<16x32xf32>
    %185 = vector.shape_cast %182 : vector<16x32xf32> to vector<1x16x32xf32>
    tpu.vector_store %arg10[%c3_95, %c0_96, %c0_97], %185 {strides = array<i32>} : memref<4x16x32xf32, #tpu.memory_space<vmem>>, vector<1x16x32xf32>,
    %c3_98 = arith.constant 3 : index
    %c0_99 = arith.constant 0 : index
    %c0_100 = arith.constant 0 : index
    %186 = vector.load %arg8[%c3_98, %c0_99, %c0_100] : memref<4x16x1xf32, #tpu.memory_space<vmem>>, vector<1x16x1xf32>
    %187 = vector.shape_cast %186 : vector<1x16x1xf32> to vector<16x1xf32>
    %188 = vector.shape_cast %160 : vector<16x1xf32> to vector<1x16x1xf32>
    tpu.vector_store %arg8[%c3_98, %c0_99, %c0_100], %188 {strides = array<i32>} : memref<4x16x1xf32, #tpu.memory_space<vmem>>, vector<1x16x1xf32>,
    %c0_i32_101 = arith.constant 0 : i32
    %189 = arith.cmpi eq, %arg1, %c0_i32_101 : i32
    %190 = arith.extui %189 : i1 to i32
    %c0_i32_102 = arith.constant 0 : i32
    %191 = arith.cmpi ne, %190, %c0_i32_102 : i32
    scf.if %191 {
      %cst_103 = arith.constant 0.000000e+00 : f32
      %192 = vector.broadcast %cst_103 : f32 to vector<16x32xf32>
      %c0_104 = arith.constant 0 : index
      %c0_105 = arith.constant 0 : index
      %c0_106 = arith.constant 0 : index
      %193 = vector.load %arg10[%c0_104, %c0_105, %c0_106] : memref<4x16x32xf32, #tpu.memory_space<vmem>>, vector<1x16x32xf32>
      %194 = vector.shape_cast %193 : vector<1x16x32xf32> to vector<16x32xf32>
      %c0_107 = arith.constant 0 : index
      %c0_108 = arith.constant 0 : index
      %c0_109 = arith.constant 0 : index
      %195 = vector.load %arg9[%c0_107, %c0_108, %c0_109] : memref<4x16x1xf32, #tpu.memory_space<vmem>>, vector<1x16x1xf32>
      %196 = vector.shape_cast %195 : vector<1x16x1xf32> to vector<16x1xf32>
      %197 = tpu.reciprocal %196 {approx = true} : vector<16x1xf32> -> vector<16x1xf32>
      %198 = vector.broadcast %197 : vector<16x1xf32> to vector<16x32xf32>
      %199 = arith.mulf %194, %198 : vector<16x32xf32>
      %200 = arith.addf %192, %199 : vector<16x32xf32>
      %c1_110 = arith.constant 1 : index
      %c0_111 = arith.constant 0 : index
      %c0_112 = arith.constant 0 : index
      %201 = vector.load %arg10[%c1_110, %c0_111, %c0_112] : memref<4x16x32xf32, #tpu.memory_space<vmem>>, vector<1x16x32xf32>
      %202 = vector.shape_cast %201 : vector<1x16x32xf32> to vector<16x32xf32>
      %c1_113 = arith.constant 1 : index
      %c0_114 = arith.constant 0 : index
      %c0_115 = arith.constant 0 : index
      %203 = vector.load %arg9[%c1_113, %c0_114, %c0_115] : memref<4x16x1xf32, #tpu.memory_space<vmem>>, vector<1x16x1xf32>
      %204 = vector.shape_cast %203 : vector<1x16x1xf32> to vector<16x1xf32>
      %205 = tpu.reciprocal %204 {approx = true} : vector<16x1xf32> -> vector<16x1xf32>
      %206 = vector.broadcast %205 : vector<16x1xf32> to vector<16x32xf32>
      %207 = arith.mulf %202, %206 : vector<16x32xf32>
      %208 = arith.addf %200, %207 : vector<16x32xf32>
      %c2_116 = arith.constant 2 : index
      %c0_117 = arith.constant 0 : index
      %c0_118 = arith.constant 0 : index
      %209 = vector.load %arg10[%c2_116, %c0_117, %c0_118] : memref<4x16x32xf32, #tpu.memory_space<vmem>>, vector<1x16x32xf32>
      %210 = vector.shape_cast %209 : vector<1x16x32xf32> to vector<16x32xf32>
      %c2_119 = arith.constant 2 : index
      %c0_120 = arith.constant 0 : index
      %c0_121 = arith.constant 0 : index
      %211 = vector.load %arg9[%c2_119, %c0_120, %c0_121] : memref<4x16x1xf32, #tpu.memory_space<vmem>>, vector<1x16x1xf32>
      %212 = vector.shape_cast %211 : vector<1x16x1xf32> to vector<16x1xf32>
      %213 = tpu.reciprocal %212 {approx = true} : vector<16x1xf32> -> vector<16x1xf32>
      %214 = vector.broadcast %213 : vector<16x1xf32> to vector<16x32xf32>
      %215 = arith.mulf %210, %214 : vector<16x32xf32>
      %216 = arith.addf %208, %215 : vector<16x32xf32>
      %c3_122 = arith.constant 3 : index
      %c0_123 = arith.constant 0 : index
      %c0_124 = arith.constant 0 : index
      %217 = vector.load %arg10[%c3_122, %c0_123, %c0_124] : memref<4x16x32xf32, #tpu.memory_space<vmem>>, vector<1x16x32xf32>
      %218 = vector.shape_cast %217 : vector<1x16x32xf32> to vector<16x32xf32>
      %c3_125 = arith.constant 3 : index
      %c0_126 = arith.constant 0 : index
      %c0_127 = arith.constant 0 : index
      %219 = vector.load %arg9[%c3_125, %c0_126, %c0_127] : memref<4x16x1xf32, #tpu.memory_space<vmem>>, vector<1x16x1xf32>
      %220 = vector.shape_cast %219 : vector<1x16x1xf32> to vector<16x1xf32>
      %221 = tpu.reciprocal %220 {approx = true} : vector<16x1xf32> -> vector<16x1xf32>
      %222 = vector.broadcast %221 : vector<16x1xf32> to vector<16x32xf32>
      %223 = arith.mulf %218, %222 : vector<16x32xf32>
      %224 = arith.addf %216, %223 : vector<16x32xf32>
      %cst_128 = arith.constant 2.500000e-01 : f32
      %225 = vector.broadcast %cst_128 : f32 to vector<16x32xf32>
      %226 = arith.mulf %224, %225 : vector<16x32xf32>
      %c0_129 = arith.constant 0 : index
      %c0_130 = arith.constant 0 : index
      %227 = vector.load %arg6[%c0_129, %c0_130] : memref<1x32xf32, #tpu.memory_space<vmem>>, vector<1x32xf32>
      %228 = vector.broadcast %227 : vector<1x32xf32> to vector<16x32xf32>
      %229 = arith.addf %226, %228 : vector<16x32xf32>
      %c0_131 = arith.constant 0 : index
      %c0_132 = arith.constant 0 : index
      %230 = vector.load %arg7[%c0_131, %c0_132] : memref<16x32xf32, #tpu.memory_space<vmem>>, vector<16x32xf32>
      tpu.vector_store %arg7[%c0_131, %c0_132], %229 {strides = array<i32>} : memref<16x32xf32, #tpu.memory_space<vmem>>, vector<16x32xf32>,
    } else {
    }
    return
  }
  func.func @transform_0(%arg0: i32, %arg1: i32) -> (i32, i32) {
    %c0_i32 = arith.constant 0 : i32
    %c0_i32_0 = arith.constant 0 : i32
    return %arg0, %c0_i32 : i32, i32
  }
  func.func @transform_1(%arg0: i32, %arg1: i32) -> (i32, i32) {
    %c0_i32 = arith.constant 0 : i32
    %c0_i32_0 = arith.constant 0 : i32
    return %c0_i32, %arg1 : i32, i32
  }
  func.func @transform_2(%arg0: i32, %arg1: i32) -> (i32, i32) {
    %c0_i32 = arith.constant 0 : i32
    %c0_i32_0 = arith.constant 0 : i32
    return %arg1, %c0_i32 : i32, i32
  }
  func.func @transform_3(%arg0: i32, %arg1: i32) -> (i32, i32) {
    %c0_i32 = arith.constant 0 : i32
    return %arg0, %arg1 : i32, i32
  }
  func.func @transform_4(%arg0: i32, %arg1: i32) -> (i32, i32) {
    %c0_i32 = arith.constant 0 : i32
    %c0_i32_0 = arith.constant 0 : i32
    %c0_i32_1 = arith.constant 0 : i32
    return %c0_i32, %c0_i32_0 : i32, i32
  }
  func.func @transform_5(%arg0: i32, %arg1: i32) -> (i32, i32) {
    %c0_i32 = arith.constant 0 : i32
    %c0_i32_0 = arith.constant 0 : i32
    return %arg0, %c0_i32 : i32, i32
  }
}

</mosaic_0001>

<bundles_post_ra>
// kernel: hlocal_pool.3
= control target key start
LH: loop header
LB: loop body
LE: loop exit
PB: predicated region body
PF: predicated region fallthrough
CT: control target
= control target key end

     0   :  { %v791_v1 = vmov 0.0   ;;  %vm792_vm0 = vmmov 0   ;;  %vm44_vm1 = vcmask 130048   ;;  %v793_v5 = vmov 0   ;;  %s979_s0 = inlined_call_operand.vmem [shape: f32[16,32], index: 0, kind: input, shape index: {}]   ;;  %s980_s1 = inlined_call_operand.vmem [shape: f32[2,16], index: 1, kind: input, shape index: {}]   ;;  %s981_s2 = inlined_call_operand.vmem [shape: f32[16,2], index: 2, kind: input, shape index: {}]   ;;  %s982_s3 = inlined_call_operand.vmem [shape: f32[2,1], index: 3, kind: input, shape index: {}]   ;;  %s983_s4 = inlined_call_operand.vmem [shape: f32[2,16], index: 4, kind: input, shape index: {}]   ;;  %s984_s5 = inlined_call_operand.vmem [shape: f32[32,32], index: 5, kind: input, shape index: {}]   ;;  %s985_s6 = inlined_call_operand.vmem [shape: f32[16,32], index: 6, kind: input, shape index: {}]   ;;  %s986_s7 = inlined_call_operand.vmem [shape: f32[32,32], index: 7, kind: input, shape index: {}]   ;;  %s987_s8 = inlined_call_operand.vmem [shape: f32[1,32], index: 8, kind: input, shape index: {}]   ;;  %s988_s9 = inlined_call_operand.vmem [shape: f32[32,32], index: 9, kind: input, shape index: {}]   ;;  %s989_s10 = inlined_call_operand.vmem [shape: f32[1,32], index: 10, kind: input, shape index: {}]   ;;  %s990_s11 = inlined_call_operand.hbm [shape: f32[2,32], index: 11, kind: output, shape index: {}]  }
   0x1   :  { %v858_v0 = vld [vmem:[%s979_s0 + $0x8] sm:$0xff]  ;;  %691 = vmatprep.subr.mxu1 %v791_v1  ;;  %v864_v2 = vld [vmem:[%s979_s0] sm:$0xff]  ;;  %695 = vmatprep.mubr.msk.f32.mxu1 %vm792_vm0, %v791_v1 }
   0x2   :  { %v118_v3 = vld [vmem:[%s982_s3] sm:$0x3]  ;;  %692 = vmatpush3.msra.mxu1 %v858_v0  ;;  %754 = vset.pattern.permute.xlu0 %v793_v5 }
   0x3   :  { %v875_v4 = vld [vmem:[%s980_s1] sm:$0x3] }
   0x4   :  { %16 = vsyncpa [#allocation3], 0  ;;  %693 = vmatprep.subr.mxu1 %v791_v1  ;;  %121 = vperm.xlu0 %754, %v118_v3   ;;  %v128_v6 = vld [vmem:[%s984_s5 + $0x18] sm:$0xff]  ;;  %v127_v7 = vld [vmem:[%s984_s5 + $0x10] sm:$0xff]  ;;  %vm129_vm2 = vcmask 261120   ;;  %vm204_vm3 = vcmask 15360  }
   0x5   :  { %694 = vmatpush3.msra.mxu1 %v864_v2  ;;  %v126_v8 = vld [vmem:[%s984_s5 + $0x8] sm:$0xff]  ;;  %v125_v9 = vld [vmem:[%s984_s5] sm:$0xff]  ;;  %vm211_vm4 = vcmask 1041408   ;;  %v388_v25 = vld [vmem:[%s986_s7 + $0x18] sm:$0xff]  ;;  %s794_s5 = smov [#allocation2]   ;;  %vm634_vm5 = vcmask 254976  }
   0x6   :  { %696 = vmatmul.mubr.msk.f32.vlgmr.msra.gmra.mxu1 %vm44_vm1, %v875_v4  ;;  %698 = vmatprep.subr.mxu1 %v791_v1  ;;  %v42_v14 = vld [vmem:[%s981_s2] sm:$0xff]  ;;  %v43_v18 = vld [vmem:[%s981_s2 + $0x8] sm:$0xff]  ;;  %v387_v26 = vld [vmem:[%s986_s7 + $0x10] sm:$0xff]  ;;  %s642_s13 = sshll.u32 %s794_s5, 4  ;;  %s643_s13 = int_to_ptr.vmem [resolvable:$true] %s642_s13 }
   0x7   :  { %699 = vmatpush3.msra.mxu1 %v128_v6  ;;  %706 = vmatprep.mubr.msk.f32.mxu1 %vm792_vm0, %v791_v1  ;;  %v386_v27 = vld [vmem:[%s986_s7 + $0x8] sm:$0xff]  ;;  %v383_v41 = vld [vmem:[%s985_s6] sm:$0xff]  ;;  %v553_v48 = vld [vmem:[%s988_s9 + $0x18] sm:$0xff]  ;;  %p774_p1 = scmp.lt.s32.totalorder %s643_s13, %s643_s13 }
   0x8   :  { %700 = vmatprep.subr.mxu1 %v791_v1  ;;  %711 = vmatprep.mubr.msk.f32.mxu0 %vm204_vm3, %v42_v14  ;;  %v384_v40 = vld [vmem:[%s985_s6 + $0x8] sm:$0xff]  ;;  %v382_v42 = vld [vmem:[%s983_s4] sm:$0x3]  ;;  %v552_v49 = vld [vmem:[%s988_s9 + $0x10] sm:$0xff] }
   0x9   :  { %701 = vmatpush3.msra.mxu1 %v127_v7  ;;  %v385_v43 = vld [vmem:[%s986_s7] sm:$0xff]  ;;  %v551_v50 = vld [vmem:[%s988_s9 + $0x8] sm:$0xff] }
   0xa   :  { %702 = vmatprep.subr.mxu1 %v791_v1  ;;  %v550_v51 = vld [vmem:[%s988_s9] sm:$0xff] }
   0xb   :  { %703 = vmatpush3.msra.mxu1 %v126_v8  ;;  %v660_v53 = vld [vmem:[%s987_s8] ss:$0 sm:$0xff]  ;;  %s769_s8 = scalar_lea.vmem %s643_s13, 32 }
   0xc   :  { %704 = vmatprep.subr.mxu1 %v791_v1  ;;  %v662_v62 = vld [vmem:[%s989_s10] ss:$0 sm:$0xff]  ;;  %p770_p0 = scmp.ne.s32.totalorder %s643_s13, %s769_s8  ;;  %p775_p2 = scmp.lt.s32.totalorder %s769_s8, %s769_s8 }
   0xd   :  { %705 = vmatpush3.msra.mxu1 %v125_v9 }
   0xe   :  { %721 = vmatprep.subr.mxu1 %v791_v1  ;;  %p776_p3 = por %p775_p2, %p774_p1 }
  0x10   :  { %p777_p4 = pnand %p776_p3, %p770_p0 }
  0x7f   :  { %v122_v10 = vpop.permute.xlu0 %121 }
  0xc6   :  { %v114_v11 = vpop.f32.mrf.mxu1 }
  0xc7   :  { %v124_v12 = vmul.f32 %v122_v10, %v114_v11 }
  0xc8   :  { %v697_v13 = vpop.f32.mrf.mxu1 }
  0xc9   :  { %707 = vmatmul.mubr.msk.f32.vlgmr.msra.gmra.mxu1 %vm129_vm2, %v124_v12 }
  0xca   :  { %729 = vmatprep.mubr.msk.f32.mxu1 %vm792_vm0, %v791_v1  ;;  %722 = vmatpush3.msra.mxu1 %v388_v25 }
  0xcb   :  { %723 = vmatprep.subr.mxu1 %v791_v1 }
  0xcc   :  { %724 = vmatpush3.msra.mxu1 %v387_v26 }
  0xcd   :  { %725 = vmatprep.subr.mxu1 %v791_v1 }
  0xce   :  { %726 = vmatpush3.msra.mxu1 %v386_v27 }
  0xcf   :  { %727 = vmatprep.subr.mxu1 %v791_v1 }
  0xd0   :  { %728 = vmatpush3.msra.mxu1 %v385_v43 }
 0x189   :  { %v199_v15 = vpop.f32.mrf.mxu1 }
 0x18a   :  { %755 = vtanh.f32 %v199_v15 }
 0x18b   :  { %v708_v16 = vpop.f32.mrf.mxu1 }
 0x197   :  { %v756_v17 = vpop.eup %755 }
 0x198   :  { %709 = vmatprep.subr.msk.mxu0 %vm211_vm4, %v756_v17 }
 0x199   :  { %710 = vmatpush3.msk.msra.mxu0 %vm211_vm4, %v756_v17 }
 0x19a   :  { %712 = vmatmul.mubr.msk.f32.vlgmr.msra.gmra.mxu0 %vm204_vm3, %v43_v18  ;;  %714 = vmatprep.subr.mxu0 %v791_v1 }
 0x19b   :  { %718 = vmatprep.mubr.msk.f32.mxu0 %vm792_vm0, %v791_v1 }
 0x25a   :  { %v713_v19 = vpop.f32.mrf.mxu0 }
 0x25b   :  { %v291_v20 = vmul.f32 %v713_v19, %v858_v0 }
 0x25c   :  { %v281_v21 = vpop.f32.mrf.mxu0 }
 0x25d   :  { %v290_v22 = vmul.f32 %v281_v21, %v864_v2  ;;  %v295_v23 = vsel %vm129_vm2, %v291_v20, 0.0 }
 0x25e   :  { %296 = vadd.xlane.f32.xlu0 %v295_v23 }
 0x25f   :  { %v292_v24 = vsel %vm129_vm2, %v290_v22, 0.0 }
 0x260   :  { %293 = vadd.xlane.f32.xlu1 %v292_v24 }
 0x2e7   :  { %v297_v28 = vpop.xlane.xlu0 %296 }
 0x2e8   :  { %v656_v29 = vmul.f32 -1.442695, %v297_v28 }
 0x2e9   :  { %v294_v30 = vpop.xlane.xlu1 %293 }
 0x2ea   :  { %757 = vpow2.f32 %v656_v29  ;;  %v655_v31 = vmul.f32 -1.442695, %v294_v30 }
 0x2ec   :  { %759 = vpow2.f32 %v655_v31 }
 0x2f7   :  { %v758_v32 = vpop.eup %757 }
 0x2f8   :  { %v305_v33 = vadd.f32 1.0, %v758_v32 }
 0x2f9   :  { %v760_v34 = vpop.eup %759 }
 0x2fa   :  { %761 = vrcp.f32 %v305_v33  ;;  %v304_v35 = vadd.f32 1.0, %v760_v34 }
 0x2fc   :  { %763 = vrcp.f32 %v304_v35 }
 0x307   :  { %v762_v36 = vpop.eup %761 }
 0x308   :  { %v311_v37 = vmul.f32 %v762_v36, %v858_v0 }
 0x309   :  { %v764_v38 = vpop.eup %763 }
 0x30a   :  { %715 = vmatpush3.msra.mxu0 %v311_v37  ;;  %v310_v39 = vmul.f32 %v764_v38, %v864_v2 }
 0x30b   :  { %716 = vmatprep.subr.mxu0 %v791_v1 }
 0x30c   :  { %717 = vmatpush3.msra.mxu0 %v310_v39 }
 0x30d   :  { %719 = vmatmul.mubr.msk.f32.vlgmr.msra.gmra.mxu0 %vm44_vm1, %v875_v4  ;;  %732 = vmatprep.subr.mxu0 %v791_v1 }
 0x30e   :  { %733 = vmatpush3.msra.mxu0 %v384_v40  ;;  %736 = vmatprep.mubr.msk.f32.mxu0 %vm792_vm0, %v791_v1 }
 0x30f   :  { %734 = vmatprep.subr.mxu0 %v791_v1 }
 0x310   :  { %735 = vmatpush3.msra.mxu0 %v383_v41 }
 0x311   :  { %739 = vmatprep.subr.mxu0 %v791_v1  ;;  %737 = vmatmul.mubr.msk.f32.vlgmr.msra.gmra.mxu0 %vm44_vm1, %v382_v42 }
 0x312   :  { %747 = vmatprep.mubr.msk.f32.mxu0 %vm792_vm0, %v791_v1  ;;  %740 = vmatpush3.msra.mxu0 %v553_v48 }
 0x313   :  { %741 = vmatprep.subr.mxu0 %v791_v1 }
 0x314   :  { %742 = vmatpush3.msra.mxu0 %v552_v49 }
 0x315   :  { %743 = vmatprep.subr.mxu0 %v791_v1 }
 0x316   :  { %744 = vmatpush3.msra.mxu0 %v551_v50 }
 0x317   :  { %745 = vmatprep.subr.mxu0 %v791_v1 }
 0x318   :  { %746 = vmatpush3.msra.mxu0 %v550_v51 }
 0x3cd   :  { %v378_v44 = vpop.f32.mrf.mxu0 }
 0x3ce   :  { %730 = vmatmul.mubr.msk.f32.vlgmr.msra.gmra.mxu1 %vm129_vm2, %v378_v44 }
 0x3cf   :  { %v720_v45 = vpop.f32.mrf.mxu0 }
 0x3d1   :  { %v531_v46 = vpop.f32.mrf.mxu0 }
 0x3d3   :  { %v738_v47 = vpop.f32.mrf.mxu0 }
 0x48e   :  { %v458_v52 = vpop.f32.mrf.mxu1 }
 0x48f   :  { %v532_v54 = vadd.f32 %v531_v46, %v458_v52 }
 0x490   :  { %v731_v55 = vpop.f32.mrf.mxu1 }
 0x491   :  { %v542_v56 = vadd.f32 %v660_v53, %v532_v54 }
 0x493   :  { %v661_v57 = vmul.f32 -1.442695, %v542_v56 }
 0x495   :  { %765 = vpow2.f32 %v661_v57 }
 0x4a2   :  { %v766_v58 = vpop.eup %765 }
 0x4a3   :  { %v546_v59 = vadd.f32 1.0, %v766_v58 }
 0x4a5   :  { %767 = vrcp.f32 %v546_v59 }
 0x4b2   :  { %v768_v60 = vpop.eup %767 }
 0x4b3   :  { %v549_v61 = vmul.f32 %v768_v60, %v542_v56 }
 0x4b5   :  { %748 = vmatmul.mubr.msk.f32.vlgmr.msra.gmra.mxu0 %vm129_vm2, %v549_v61 }
 0x575   :  { %v630_v63 = vpop.f32.mrf.mxu0 }
 0x576   :  { %v631_v0 = vadd.f32 %v662_v62, %v630_v63 }
 0x577   :  { %v749_v1 = vpop.f32.mrf.mxu0 }
 0x578   :  { %635 = vst.msk [vmem:[#allocation2] sm:$0x3] %vm634_vm5, %v631_v0 }
 0x579   :  { %780 = shalt.err (!%p777_p4)
}
 0x57a   :  { %645 = dma.vmem_to_hbm [thread:$0]  %s643_s13, 32, %s990_s11, [#allocation3]  }
 0x57b   :  { %789 = dma.done.wait [#allocation3], 32  }
 0x57c   :  { %790 = vsyncadd [#allocation3], 4294967264 }
 0x57d   :  { %649 = vsyncpa [#allocation3], 1 }

// kernel: hlocal_pool.2
= control target key start
LH: loop header
LB: loop body
LE: loop exit
PB: predicated region body
PF: predicated region fallthrough
CT: control target
= control target key end

     0   :  { %v834_v0 = vmov 1   ;;  %v835_v1 = vmov 0   ;;  %v836_v4 = vmov 2   ;;  %v837_v5 = vmov 3   ;;  %s842_s27 = smov 64   ;;  %s843_s28 = smov 32   ;;  %s1152_s0 = inlined_call_operand.vmem [shape: f32[16,4], index: 0, kind: input, shape index: {}]   ;;  %s1153_s3 = inlined_call_operand.vmem [shape: bf16[16,16], index: 3, kind: input, shape index: {}]   ;;  %s1154_s1 = inlined_call_operand.vmem [shape: f32[4,16], index: 1, kind: input, shape index: {}]   ;;  %s1155_s2 = inlined_call_operand.vmem [shape: bf16[16,128], index: 2, kind: input, shape index: {}]   ;;  %s1156_s4 = inlined_call_operand.vmem [shape: f32[1,32], index: 4, kind: input, shape index: {}]   ;;  %s1157_s5 = inlined_call_operand.vmem [shape: f32[16,32], index: 5, kind: output, shape index: {}]  }
   0x1   :  { %778 = vset.pattern.permute.xlu1 %v834_v0  ;;  %777 = vset.pattern.permute.xlu0 %v835_v1  ;;  %v59_v2 = vld [vmem:[%s1152_s0] sm:$0xff]  ;;  %v60_v3 = vld [vmem:[%s1152_s0 + $0x8] sm:$0xff]  ;;  %vm27_vm0 = vcmask 7168   ;;  %v838_v6 = vmov -1e+09   ;;  %v72_v7 = vlaneseq  ;;  %vm94_vm6 = vcmask 130048  }
   0x2   :  { %213 = vperm.xlu1 %778, %v59_v2   ;;  %64 = vperm.xlu0 %777, %v59_v2   ;;  %28 = vst.msk [vmem:[#allocation2] sm:$0xff] %vm27_vm0, %v838_v6  ;;  %29 = vst.msk [vmem:[#allocation2 + $0x8] sm:$0xff] %vm27_vm0, %v838_v6  ;;  %v53_v9 = vld [vmem:[%s1153_s3] sm:$0xf]  ;;  %v54_v12 = vld [vmem:[%s1153_s3 + $0x4] sm:$0xf] }
   0x3   :  { %30 = vst.msk [vmem:[#allocation2 + $0x10] sm:$0xff] %vm27_vm0, %v838_v6  ;;  %31 = vst.msk [vmem:[#allocation2 + $0x18] sm:$0xff] %vm27_vm0, %v838_v6  ;;  %v73_v8 = vshrl.u32 %v72_v7, 7  ;;  %vm55_vm1 = vcmp.gt.bf16.partialorder %v53_v9, 0  ;;  %v61_v13 = vld [vmem:[%s1154_s1] sm:$0xf] }
   0x4   :  { %32 = vst.msk [vmem:[#allocation2 + $0x20] sm:$0xff] %vm27_vm0, %v838_v6  ;;  %33 = vst.msk [vmem:[#allocation2 + $0x28] sm:$0xff] %vm27_vm0, %v838_v6  ;;  %v84_v14 = vsel %vm55_vm1, 65537, %v835_v1  ;;  %vm56_vm2 = vcmp.gt.bf16.partialorder %v54_v12, 0  ;;  %vm840_vm14 = vmmov 0   ;;  %vm44_vm15 = vcmask 261120  }
   0x5   :  { %34 = vst.msk [vmem:[#allocation2 + $0x30] sm:$0xff] %vm27_vm0, %v838_v6  ;;  %35 = vst.msk [vmem:[#allocation2 + $0x38] sm:$0xff] %vm27_vm0, %v838_v6  ;;  %v222_v10 = vsub.s32 1, %v73_v8  ;;  %v74_v11 = vsub.s32 0, %v73_v8  ;;  %v86_v17 = vunpack.c.l.b16 %v84_v14  ;;  %v85_v18 = vsel %vm56_vm2, 65537, %v835_v1 }
   0x6   :  { %217 = vperm.xlu1 %778, %v60_v3   ;;  %69 = vperm.xlu0 %777, %v60_v3   ;;  %v361_v24 = vsub.s32 2, %v73_v8  ;;  %v87_v25 = vunpack.c.l.b16 %v85_v18  ;;  %v500_v40 = vsub.s32 3, %v73_v8 }
   0x7   :  { %v223_v15 = vrot.slane %v61_v13, %v222_v10  ;;  %v75_v16 = vrot.slane %v61_v13, %v74_v11  ;;  %vm897_vm3 = vcmp.ne.s32.totalorder %v86_v17, 0  ;;  %v839_v10 = vmov 0.0   ;;  %v974_v11 = vld [vmem:[%s1155_s2] sm:$0xff]   ;;  %s841_s2 = smov 96  }
   0x8   :  { %v362_v35 = vrot.slane %v61_v13, %v361_v24  ;;  %vm905_vm7 = vcmp.ne.s32.totalorder %v87_v25, 0  ;;  %v501_v51 = vrot.slane %v61_v13, %v500_v40  ;;  %743 = vmatprep.subr.bf16.mxu0 %v839_v10  ;;  %36 = vst.msk [vmem:[#allocation3] sm:$0xff] %vm27_vm0, %v839_v10  ;;  %37 = vst.msk [vmem:[#allocation3 + $0x8] sm:$0xff] %vm27_vm0, %v839_v10  ;;  %749 = vmatprep.subr.bf16.mxu1 %v839_v10 }
   0x9   :  { %38 = vst.msk [vmem:[#allocation3 + $0x10] sm:$0xff] %vm27_vm0, %v839_v10  ;;  %39 = vst.msk [vmem:[#allocation3 + $0x18] sm:$0xff] %vm27_vm0, %v839_v10  ;;  %744 = vmatpush3.bf16.msra.mxu0 %v974_v11  ;;  %v92_v12 = vld [vmem:[#allocation2] sm:$0xff]  ;;  %745 = vmatprep.mubr.msk.bf16.mxu0 %vm840_vm14, %v839_v10 }
   0xa   :  { %780 = vset.pattern.permute.xlu1 %v836_v4  ;;  %779 = vset.pattern.permute.xlu0 %v836_v4  ;;  %40 = vst.msk [vmem:[#allocation3 + $0x20] sm:$0xff] %vm27_vm0, %v839_v10  ;;  %41 = vst.msk [vmem:[#allocation3 + $0x28] sm:$0xff] %vm27_vm0, %v839_v10 }
   0xb   :  { %356 = vperm.xlu1 %780, %v60_v3   ;;  %352 = vperm.xlu0 %779, %v59_v2   ;;  %42 = vst.msk [vmem:[#allocation3 + $0x30] sm:$0xff] %vm27_vm0, %v839_v10  ;;  %43 = vst.msk [vmem:[#allocation3 + $0x38] sm:$0xff] %vm27_vm0, %v839_v10  ;;  %v1001_v24 = vld [vmem:[#allocation2 + $0x20] sm:$0xff] }
   0xc   :  { %755 = vmatprep.subr.bf16.mxu0 %v839_v10  ;;  %751 = vmatprep.mubr.msk.bf16.mxu1 %vm840_vm14, %v839_v10  ;;  %45 = vst.msk [vmem:[#allocation4] sm:$0xff] %vm44_vm15, %v839_v10  ;;  %46 = vst.msk [vmem:[#allocation4 + $0x8] sm:$0xff] %vm44_vm15, %v839_v10 }
   0xd   :  { %47 = vst.msk [vmem:[#allocation4 + $0x10] sm:$0xff] %vm44_vm15, %v839_v10  ;;  %48 = vst.msk [vmem:[#allocation4 + $0x18] sm:$0xff] %vm44_vm15, %v839_v10 }
   0xe   :  { %49 = vst.msk [vmem:[#allocation4 + $0x20] sm:$0xff] %vm44_vm15, %v839_v10  ;;  %50 = vst.msk [vmem:[#allocation4 + $0x28] sm:$0xff] %vm44_vm15, %v839_v10 }
   0xf   :  { %781 = vset.pattern.permute.xlu1 %v837_v5  ;;  %782 = vset.pattern.permute.xlu0 %v837_v5  ;;  %51 = vst.msk [vmem:[#allocation4 + $0x30] sm:$0xff] %vm44_vm15, %v839_v10  ;;  %52 = vst.msk [vmem:[#allocation4 + $0x38] sm:$0xff] %vm44_vm15, %v839_v10 }
  0x10   :  { %491 = vperm.xlu1 %781, %v59_v2   ;;  %495 = vperm.xlu0 %782, %v60_v3  }
  0x14   :  { %783 = vset.pattern.permute.xlu1 %v835_v1  ;;  %784 = vset.pattern.permute.xlu0 %v835_v1 }
  0x7d   :  { %v214_v19 = vpop.permute.xlu1 %213  ;;  %v65_v20 = vpop.permute.xlu0 %64 }
  0x7e   :  { %v224_v21 = vadd.f32 %v223_v15, %v214_v19  ;;  %v76_v22 = vadd.f32 %v75_v16, %v65_v20 }
  0x80   :  { %v228_v26 = vmul.f32 0.2, %v224_v21  ;;  %v80_v27 = vmul.f32 0.2, %v76_v22  ;;  %vm78_vm4 = vcmp.gt.f32.partialorder %v76_v22, 0.0  ;;  %vm226_vm5 = vcmp.gt.f32.partialorder %v224_v21, 0.0 }
  0x81   :  { %v218_v28 = vpop.permute.xlu1 %217  ;;  %v70_v29 = vpop.permute.xlu0 %69 }
  0x82   :  { %v225_v30 = vadd.f32 %v223_v15, %v218_v28  ;;  %v77_v31 = vadd.f32 %v75_v16, %v70_v29  ;;  %v82_v32 = vsel %vm78_vm4, %v76_v22, %v80_v27  ;;  %v230_v33 = vsel %vm226_vm5, %v224_v21, %v228_v26  ;;  %v978_v15 = vld [vmem:[#allocation2 + $0x10] sm:$0xff]  ;;  %v980_v16 = vld [vmem:[#allocation2 + $0x8] sm:$0xff]  ;;  %v989_v21 = vld [vmem:[#allocation2 + $0x18] sm:$0xff] }
  0x83   :  { %v903_v34 = vsel %vm897_vm3, %v82_v32, -1e+30  ;;  %v913_v41 = vsel %vm897_vm3, %v230_v33, -1e+30  ;;  %v1009_v29 = vld [vmem:[#allocation2 + $0x28] sm:$0xff]  ;;  %v1021_v33 = vld [vmem:[#allocation2 + $0x30] sm:$0xff] }
  0x84   :  { %v229_v37 = vmul.f32 0.2, %v225_v30  ;;  %v81_v38 = vmul.f32 0.2, %v77_v31  ;;  %v95_v39 = vsel %vm94_vm6, %v903_v34, -inf  ;;  %vm79_vm8 = vcmp.gt.f32.partialorder %v77_v31, 0.0 }
  0x85   :  { %96 = vmax.xlane.f32.xlu1 %v95_v39  ;;  %vm227_vm9 = vcmp.gt.f32.partialorder %v225_v30, 0.0  ;;  %v237_v49 = vsel %vm94_vm6, %v913_v41, -inf }
  0x86   :  { %v357_v42 = vpop.permute.xlu1 %356  ;;  %v353_v43 = vpop.permute.xlu0 %352  ;;  %v83_v44 = vsel %vm79_vm8, %v77_v31, %v81_v38  ;;  %v231_v45 = vsel %vm227_vm9, %v225_v30, %v229_v37  ;;  %v1026_v37 = vld [vmem:[#allocation2 + $0x38] sm:$0xff] }
  0x87   :  { %v364_v46 = vadd.f32 %v362_v35, %v357_v42  ;;  %v363_v47 = vadd.f32 %v362_v35, %v353_v43  ;;  %v917_v48 = vsel %vm905_vm7, %v83_v44, -1e+30  ;;  %v925_v52 = vsel %vm905_vm7, %v231_v45, -1e+30 }
  0x88   :  { %v98_v50 = vsel %vm94_vm6, %v917_v48, -inf  ;;  %v240_v60 = vsel %vm94_vm6, %v925_v52, -inf }
  0x89   :  { %v368_v53 = vmul.f32 0.2, %v364_v46  ;;  %v367_v54 = vmul.f32 0.2, %v363_v47  ;;  %238 = vmax.xlane.f32.xlu1 %v237_v49  ;;  %99 = vmax.xlane.f32.xlu0 %v98_v50  ;;  %vm365_vm10 = vcmp.gt.f32.partialorder %v363_v47, 0.0  ;;  %vm366_vm11 = vcmp.gt.f32.partialorder %v364_v46, 0.0 }
  0x8b   :  { %v492_v55 = vpop.permute.xlu1 %491  ;;  %v369_v56 = vsel %vm365_vm10, %v363_v47, %v367_v54  ;;  %v496_v57 = vpop.permute.xlu0 %495  ;;  %v370_v58 = vsel %vm366_vm11, %v364_v46, %v368_v53 }
  0x8c   :  { %v502_v59 = vadd.f32 %v501_v51, %v492_v55  ;;  %v931_v61 = vsel %vm897_vm3, %v369_v56, -1e+30  ;;  %v503_v62 = vadd.f32 %v501_v51, %v496_v57  ;;  %v937_v0 = vsel %vm905_vm7, %v370_v58, -1e+30 }
  0x8d   :  { %241 = vmax.xlane.f32.xlu0 %v240_v60  ;;  %v376_v63 = vsel %vm94_vm6, %v931_v61, -inf  ;;  %v379_v3 = vsel %vm94_vm6, %v937_v0, -inf }
  0x8e   :  { %v506_v1 = vmul.f32 0.2, %v502_v59  ;;  %377 = vmax.xlane.f32.xlu1 %v376_v63  ;;  %v507_v2 = vmul.f32 0.2, %v503_v62  ;;  %vm504_vm12 = vcmp.gt.f32.partialorder %v502_v59, 0.0  ;;  %vm505_vm13 = vcmp.gt.f32.partialorder %v503_v62, 0.0 }
  0x90   :  { %v508_v4 = vsel %vm504_vm12, %v502_v59, %v506_v1  ;;  %v509_v5 = vsel %vm505_vm13, %v503_v62, %v507_v2 }
  0x91   :  { %380 = vmax.xlane.f32.xlu0 %v379_v3  ;;  %v943_v6 = vsel %vm897_vm3, %v508_v4, -1e+30  ;;  %v947_v7 = vsel %vm905_vm7, %v509_v5, -1e+30 }
  0x92   :  { %v515_v8 = vsel %vm94_vm6, %v943_v6, -inf  ;;  %v518_v9 = vsel %vm94_vm6, %v947_v7, -inf }
  0x93   :  { %516 = vmax.xlane.f32.xlu1 %v515_v8 }
  0x95   :  { %519 = vmax.xlane.f32.xlu0 %v518_v9 }
 0x10e   :  { %v97_v13 = vpop.xlane.xlu1 %96 }
 0x10f   :  { %v101_v14 = vmax.f32 %v92_v12, %v97_v13 }
 0x111   :  { %210 = vst.msk [vmem:[#allocation2] sm:$0xff] %vm27_vm0, %v101_v14  ;;  %111 = vperm.xlu1 %783, %v101_v14   ;;  %v103_v42 = vsub.f32 %v92_v12, %v101_v14 }
 0x112   :  { %v239_v17 = vpop.xlane.xlu1 %238  ;;  %v100_v18 = vpop.xlane.xlu0 %99 }
 0x113   :  { %v984_v19 = vmax.f32 %v978_v15, %v239_v17  ;;  %v987_v20 = vmax.f32 %v980_v16, %v100_v18  ;;  %v105_v46 = vmul.f32 1.442695, %v103_v42 }
 0x115   :  { %v245_v22 = vsub.f32 %v978_v15, %v984_v19  ;;  %349 = vst.msk [vmem:[#allocation2 + $0x10] sm:$0xff] %vm27_vm0, %v984_v19  ;;  %v104_v23 = vsub.f32 %v980_v16, %v987_v20  ;;  %211 = vst.msk [vmem:[#allocation2 + $0x8] sm:$0xff] %vm27_vm0, %v987_v20  ;;  %253 = vperm.xlu1 %783, %v984_v19   ;;  %116 = vperm.xlu0 %784, %v987_v20   ;;  %786 = vpow2.f32 %v105_v46 }
 0x116   :  { %v242_v25 = vpop.xlane.xlu0 %241 }
 0x117   :  { %v1004_v26 = vmax.f32 %v989_v21, %v242_v25  ;;  %v378_v27 = vpop.xlane.xlu1 %377 }
 0x118   :  { %v1007_v28 = vmax.f32 %v1001_v24, %v378_v27 }
 0x119   :  { %v246_v30 = vsub.f32 %v989_v21, %v1004_v26  ;;  %350 = vst.msk [vmem:[#allocation2 + $0x18] sm:$0xff] %vm27_vm0, %v1004_v26  ;;  %258 = vperm.xlu1 %783, %v1004_v26   ;;  %v107_v26 = vmul.f32 1.442695, %v104_v23 }
 0x11a   :  { %v384_v31 = vsub.f32 %v1001_v24, %v1007_v28  ;;  %488 = vst.msk [vmem:[#allocation2 + $0x20] sm:$0xff] %vm27_vm0, %v1007_v28  ;;  %392 = vperm.xlu0 %784, %v1007_v28   ;;  %v381_v32 = vpop.xlane.xlu0 %380  ;;  %v125_v28 = vld [vmem:[#allocation3] sm:$0xff] }
 0x11b   :  { %v1024_v35 = vmax.f32 %v1009_v29, %v381_v32 }
 0x11c   :  { %v517_v36 = vpop.xlane.xlu1 %516 }
 0x11d   :  { %v385_v38 = vsub.f32 %v1009_v29, %v1024_v35  ;;  %489 = vst.msk [vmem:[#allocation2 + $0x28] sm:$0xff] %vm27_vm0, %v1024_v35  ;;  %v1033_v39 = vmax.f32 %v1021_v33, %v517_v36  ;;  %397 = vperm.xlu1 %783, %v1024_v35   ;;  %v247_v29 = vmul.f32 1.442695, %v245_v22  ;;  %v386_v35 = vmul.f32 1.442695, %v384_v31 }
 0x11e   :  { %v520_v40 = vpop.xlane.xlu0 %519 }
 0x11f   :  { %v523_v43 = vsub.f32 %v1021_v33, %v1033_v39  ;;  %627 = vst.msk [vmem:[#allocation2 + $0x30] sm:$0xff] %vm27_vm0, %v1033_v39  ;;  %v1041_v44 = vmax.f32 %v1026_v37, %v520_v40  ;;  %v268_v33 = vld [vmem:[#allocation3 + $0x10] sm:$0xff] }
 0x121   :  { %v524_v45 = vsub.f32 %v1026_v37, %v1041_v44  ;;  %628 = vst.msk [vmem:[#allocation2 + $0x38] sm:$0xff] %vm27_vm0, %v1041_v44  ;;  %531 = vperm.xlu1 %783, %v1033_v39   ;;  %v525_v16 = vmul.f32 1.442695, %v523_v43  ;;  %v126_v43 = vld [vmem:[#allocation3 + $0x8] sm:$0xff] }
 0x122   :  { %v1072_v47 = vpop.eup %786 }
 0x123   :  { %v527_v21 = vmul.f32 1.442695, %v524_v45  ;;  %v127_v31 = vmul.f32 %v1072_v47, %v125_v28 }
 0x125   :  { %536 = vperm.xlu1 %783, %v1041_v44  }
 0x129   :  { %298 = vrot.lane.b32.xlu1 %v974_v11, %s841_s2 }
 0x12d   :  { %437 = vrot.lane.b32.xlu1 %v974_v11, %s842_s27 }
 0x131   :  { %576 = vrot.lane.b32.xlu1 %v974_v11, %s843_s28 }
 0x135   :  { %144 = vperm.xlu1 %783, %v1072_v47  }
 0x18c   :  { %v112_v49 = vpop.permute.xlu1 %111 }
 0x18d   :  { %v119_v50 = vsub.f32 %v903_v34, %v112_v49 }
 0x18f   :  { %v121_v51 = vmul.f32 1.442695, %v119_v50 }
 0x190   :  { %v254_v53 = vpop.permute.xlu1 %253  ;;  %v117_v54 = vpop.permute.xlu0 %116 }
 0x191   :  { %788 = vpow2.f32 %v121_v51  ;;  %v261_v55 = vsub.f32 %v913_v41, %v254_v53  ;;  %v120_v56 = vsub.f32 %v917_v48, %v117_v54  ;;  %v249_v51 = vmul.f32 1.442695, %v246_v30 }
 0x193   :  { %v263_v57 = vmul.f32 1.442695, %v261_v55  ;;  %v123_v58 = vmul.f32 1.442695, %v120_v56  ;;  %v388_v55 = vmul.f32 1.442695, %v385_v38 }
 0x194   :  { %v259_v59 = vpop.permute.xlu1 %258 }
 0x195   :  { %790 = vpow2.f32 %v263_v57  ;;  %v262_v60 = vsub.f32 %v925_v52, %v259_v59  ;;  %v393_v62 = vpop.permute.xlu0 %392 }
 0x196   :  { %792 = vpow2.f32 %v123_v58  ;;  %v400_v63 = vsub.f32 %v931_v61, %v393_v62 }
 0x197   :  { %v265_v1 = vmul.f32 1.442695, %v262_v60  ;;  %v269_v60 = vld [vmem:[#allocation3 + $0x18] sm:$0xff] }
 0x198   :  { %v402_v34 = vmul.f32 1.442695, %v400_v63  ;;  %v398_v2 = vpop.permute.xlu1 %397  ;;  %v407_v63 = vld [vmem:[#allocation3 + $0x20] sm:$0xff] }
 0x199   :  { %794 = vpow2.f32 %v265_v1  ;;  %v401_v3 = vsub.f32 %v937_v0, %v398_v2  ;;  %v408_v2 = vld [vmem:[#allocation3 + $0x28] sm:$0xff] }
 0x19a   :  { %796 = vpow2.f32 %v402_v34 }
 0x19b   :  { %v404_v41 = vmul.f32 1.442695, %v401_v3 }
 0x19c   :  { %v532_v4 = vpop.permute.xlu1 %531 }
 0x19d   :  { %798 = vpow2.f32 %v404_v41  ;;  %v539_v48 = vsub.f32 %v943_v6, %v532_v4 }
 0x19e   :  { %v789_v5 = vpop.eup %788 }
 0x19f   :  { %v541_v8 = vmul.f32 1.442695, %v539_v48  ;;  %v129_v52 = vsel %vm94_vm6, %v789_v5, 0.0 }
 0x1a0   :  { %130 = vadd.xlane.f32.xlu1 %v129_v52  ;;  %v537_v9 = vpop.permute.xlu1 %536 }
 0x1a1   :  { %800 = vpow2.f32 %v541_v8  ;;  %v540_v61 = vsub.f32 %v947_v7, %v537_v9  ;;  %v546_v8 = vld [vmem:[#allocation3 + $0x30] sm:$0xff] }
 0x1a2   :  { %v791_v11 = vpop.eup %790 }
 0x1a3   :  { %v793_v12 = vpop.eup %792  ;;  %v543_v13 = vmul.f32 1.442695, %v540_v61  ;;  %v272_v0 = vsel %vm94_vm6, %v791_v11, 0.0 }
 0x1a4   :  { %273 = vadd.xlane.f32.xlu1 %v272_v0  ;;  %v299_v14 = vpop.permute.xlu1 %298  ;;  %v132_v17 = vsel %vm94_vm6, %v793_v12, 0.0  ;;  %v154_v18 = vpack.c.bf16 %v793_v12, %v789_v5  ;;  %v547_v0 = vld [vmem:[#allocation3 + $0x38] sm:$0xff] }
 0x1a5   :  { %802 = vpow2.f32 %v543_v13  ;;  %133 = vadd.xlane.f32.xlu0 %v132_v17  ;;  %750 = vmatpush3.bf16.msra.mxu1 %v299_v14 }
 0x1a6   :  { %v795_v6 = vpop.eup %794  ;;  %746 = vmatmul.mubr.msk.bf16.vlgmr.msra.gmra.mxu0 %vm94_vm6, %v154_v18  ;;  %761 = vmatprep.subr.bf16.mxu1 %v839_v10  ;;  %804 = vpow2.f32 %v249_v51 }
 0x1a7   :  { %v797_v25 = vpop.eup %796  ;;  %v275_v7 = vsel %vm94_vm6, %v795_v6, 0.0  ;;  %v297_v27 = vpack.c.bf16 %v795_v6, %v791_v11  ;;  %757 = vmatprep.mubr.msk.bf16.mxu0 %vm840_vm14, %v839_v10  ;;  %806 = vpow2.f32 %v388_v55 }
 0x1a8   :  { %v438_v32 = vpop.permute.xlu1 %437  ;;  %v411_v36 = vsel %vm94_vm6, %v797_v25, 0.0  ;;  %808 = vpow2.f32 %v527_v21 }
 0x1a9   :  { %276 = vadd.xlane.f32.xlu0 %v275_v7  ;;  %752 = vmatmul.mubr.msk.bf16.vlgmr.msra.gmra.mxu1 %vm94_vm6, %v297_v27  ;;  %810 = vpow2.f32 %v107_v26  ;;  %v283_v26 = vld [vmem:[#allocation4 + $0x10] sm:$0xff] }
 0x1aa   :  { %v799_v40 = vpop.eup %798  ;;  %412 = vadd.xlane.f32.xlu1 %v411_v36  ;;  %756 = vmatpush3.bf16.msra.mxu0 %v438_v32  ;;  %812 = vpow2.f32 %v247_v29  ;;  %v141_v29 = vld [vmem:[#allocation4 + $0x8] sm:$0xff] }
 0x1ab   :  { %v414_v42 = vsel %vm94_vm6, %v799_v40, 0.0  ;;  %v436_v46 = vpack.c.bf16 %v799_v40, %v797_v25  ;;  %763 = vmatprep.mubr.msk.bf16.mxu1 %vm840_vm14, %v839_v10  ;;  %814 = vpow2.f32 %v386_v35 }
 0x1ac   :  { %v577_v49 = vpop.permute.xlu1 %576  ;;  %816 = vpow2.f32 %v525_v16 }
 0x1ad   :  { %415 = vadd.xlane.f32.xlu0 %v414_v42  ;;  %762 = vmatpush3.bf16.msra.mxu1 %v577_v49 }
 0x1ae   :  { %v801_v50 = vpop.eup %800  ;;  %758 = vmatmul.mubr.msk.bf16.vlgmr.msra.gmra.mxu0 %vm94_vm6, %v436_v46 }
 0x1af   :  { %v550_v53 = vsel %vm94_vm6, %v801_v50, 0.0 }
 0x1b0   :  { %551 = vadd.xlane.f32.xlu1 %v550_v53  ;;  %v1121_v24 = vpop.permute.xlu1 %144 }
 0x1b2   :  { %v803_v54 = vpop.eup %802 }
 0x1b3   :  { %v553_v10 = vsel %vm94_vm6, %v803_v54, 0.0  ;;  %v575_v56 = vpack.c.bf16 %v803_v54, %v801_v50  ;;  %v805_v30 = vpop.eup %804 }
 0x1b4   :  { %554 = vadd.xlane.f32.xlu0 %v553_v10  ;;  %v807_v38 = vpop.eup %806  ;;  %v271_v1 = vmul.f32 %v805_v30, %v269_v60  ;;  %v140_v10 = vld [vmem:[#allocation4] sm:$0xff] }
 0x1b5   :  { %764 = vmatmul.mubr.msk.bf16.vlgmr.msra.gmra.mxu1 %vm94_vm6, %v575_v56  ;;  %v809_v20 = vpop.eup %808  ;;  %v410_v5 = vmul.f32 %v807_v38, %v408_v2  ;;  %v152_v21 = vmul.f32 %v1121_v24, %v140_v10 }
 0x1b6   :  { %v811_v23 = vpop.eup %810  ;;  %v549_v17 = vmul.f32 %v809_v20, %v547_v0 }
 0x1b7   :  { %v813_v15 = vpop.eup %812  ;;  %v128_v57 = vmul.f32 %v811_v23, %v126_v43 }
 0x1b8   :  { %v815_v19 = vpop.eup %814  ;;  %v270_v44 = vmul.f32 %v813_v15, %v268_v33 }
 0x1b9   :  { %v817_v22 = vpop.eup %816  ;;  %v409_v34 = vmul.f32 %v815_v19, %v407_v63 }
 0x1ba   :  { %v548_v11 = vmul.f32 %v817_v22, %v546_v8 }
 0x1c1   :  { %292 = vperm.xlu1 %783, %v805_v30  }
 0x1c5   :  { %431 = vperm.xlu1 %783, %v807_v38  }
 0x1c9   :  { %570 = vperm.xlu1 %783, %v809_v20  }
 0x1ca   :  { %149 = vperm.xlu0 %784, %v811_v23   ;;  %v284_v23 = vld [vmem:[#allocation4 + $0x18] sm:$0xff] }
 0x1ce   :  { %287 = vperm.xlu0 %784, %v813_v15  }
 0x1d2   :  { %426 = vperm.xlu0 %784, %v815_v19  }
 0x1d6   :  { %565 = vperm.xlu0 %784, %v817_v22   ;;  %v422_v22 = vld [vmem:[#allocation4 + $0x20] sm:$0xff] }
 0x229   :  { %v131_v37 = vpop.xlane.xlu1 %130 }
 0x22a   :  { %v135_v39 = vadd.f32 %v131_v37, %v127_v31 }
 0x22c   :  { %138 = vst.msk [vmem:[#allocation3] sm:$0xff] %vm27_vm0, %v135_v39 }
 0x22d   :  { %v274_v45 = vpop.xlane.xlu1 %273 }
 0x22e   :  { %v278_v58 = vadd.f32 %v274_v45, %v270_v44  ;;  %v134_v59 = vpop.xlane.xlu0 %133 }
 0x22f   :  { %v136_v62 = vadd.f32 %v134_v59, %v128_v57  ;;  %v423_v57 = vld [vmem:[#allocation4 + $0x28] sm:$0xff] }
 0x230   :  { %280 = vst.msk [vmem:[#allocation3 + $0x10] sm:$0xff] %vm27_vm0, %v278_v58 }
 0x231   :  { %139 = vst.msk [vmem:[#allocation3 + $0x8] sm:$0xff] %vm27_vm0, %v136_v62 }
 0x232   :  { %v277_v47 = vpop.xlane.xlu0 %276 }
 0x233   :  { %v279_v3 = vadd.f32 %v277_v47, %v271_v1  ;;  %v413_v41 = vpop.xlane.xlu1 %412  ;;  %v634_v4 = vld [vmem:[#allocation3] sm:$0xff] }
 0x234   :  { %v417_v48 = vadd.f32 %v413_v41, %v409_v34  ;;  %818 = vrcp.f32 %v634_v4  ;;  %v561_v34 = vld [vmem:[#allocation4 + $0x30] sm:$0xff] }
 0x235   :  { %281 = vst.msk [vmem:[#allocation3 + $0x18] sm:$0xff] %vm27_vm0, %v279_v3 }
 0x236   :  { %419 = vst.msk [vmem:[#allocation3 + $0x20] sm:$0xff] %vm27_vm0, %v417_v48  ;;  %v416_v52 = vpop.xlane.xlu0 %415 }
 0x237   :  { %v418_v9 = vadd.f32 %v416_v52, %v410_v5  ;;  %v654_v61 = vld [vmem:[#allocation3 + $0x10] sm:$0xff]  ;;  %v562_v5 = vld [vmem:[#allocation4 + $0x38] sm:$0xff] }
 0x238   :  { %820 = vrcp.f32 %v654_v61  ;;  %v635_v12 = vld [vmem:[#allocation3 + $0x8] sm:$0xff] }
 0x239   :  { %420 = vst.msk [vmem:[#allocation3 + $0x28] sm:$0xff] %vm27_vm0, %v418_v9  ;;  %v552_v13 = vpop.xlane.xlu1 %551  ;;  %822 = vrcp.f32 %v635_v12 }
 0x23a   :  { %v556_v14 = vadd.f32 %v552_v13, %v548_v11 }
 0x23c   :  { %558 = vst.msk [vmem:[#allocation3 + $0x30] sm:$0xff] %vm27_vm0, %v556_v14  ;;  %v655_v18 = vld [vmem:[#allocation3 + $0x18] sm:$0xff] }
 0x23d   :  { %v555_v6 = vpop.xlane.xlu0 %554  ;;  %824 = vrcp.f32 %v655_v18  ;;  %v674_v25 = vld [vmem:[#allocation3 + $0x20] sm:$0xff]  ;;  %v293_v38 = vpop.permute.xlu1 %292 }
 0x23e   :  { %v557_v7 = vadd.f32 %v555_v6, %v549_v17  ;;  %826 = vrcp.f32 %v674_v25  ;;  %v296_v43 = vmul.f32 %v293_v38, %v284_v23  ;;  %v734_v38 = vld [vmem:[%s1156_s4] ss:$0 sm:$0xff] }
 0x240   :  { %559 = vst.msk [vmem:[#allocation3 + $0x38] sm:$0xff] %vm27_vm0, %v557_v7  ;;  %v675_v27 = vld [vmem:[#allocation3 + $0x28] sm:$0xff] }
 0x241   :  { %v819_v32 = vpop.eup %818  ;;  %828 = vrcp.f32 %v675_v27  ;;  %v432_v58 = vpop.permute.xlu1 %431 }
 0x242   :  { %640 = vperm.xlu1 %783, %v819_v32   ;;  %v435_v47 = vmul.f32 %v432_v58, %v423_v57 }
 0x243   :  { %v694_v36 = vld [vmem:[#allocation3 + $0x30] sm:$0xff] }
 0x244   :  { %830 = vrcp.f32 %v694_v36 }
 0x245   :  { %v821_v40 = vpop.eup %820  ;;  %v150_v55 = vpop.permute.xlu0 %149 }
 0x246   :  { %v823_v42 = vpop.eup %822  ;;  %660 = vperm.xlu1 %783, %v821_v40   ;;  %v153_v15 = vmul.f32 %v150_v55, %v141_v29  ;;  %v571_v8 = vpop.permute.xlu1 %570 }
 0x247   :  { %645 = vperm.xlu0 %784, %v823_v42   ;;  %v695_v46 = vld [vmem:[#allocation3 + $0x38] sm:$0xff]  ;;  %v574_v11 = vmul.f32 %v571_v8, %v562_v5 }
 0x248   :  { %832 = vrcp.f32 %v695_v46 }
 0x249   :  { %v288_v56 = vpop.permute.xlu0 %287 }
 0x24a   :  { %v825_v49 = vpop.eup %824  ;;  %v295_v16 = vmul.f32 %v288_v56, %v283_v26 }
 0x24b   :  { %v827_v50 = vpop.eup %826  ;;  %665 = vperm.xlu0 %784, %v825_v49  }
 0x24c   :  { %680 = vperm.xlu1 %783, %v827_v50  }
 0x24d   :  { %v427_v28 = vpop.permute.xlu0 %426 }
 0x24e   :  { %v829_v51 = vpop.eup %828  ;;  %v434_v44 = vmul.f32 %v427_v28, %v422_v22 }
 0x24f   :  { %685 = vperm.xlu0 %784, %v829_v51  }
 0x251   :  { %v831_v53 = vpop.eup %830  ;;  %v566_v2 = vpop.permute.xlu0 %565 }
 0x252   :  { %700 = vperm.xlu1 %783, %v831_v53   ;;  %v573_v4 = vmul.f32 %v566_v2, %v561_v34 }
 0x255   :  { %v833_v54 = vpop.eup %832 }
 0x256   :  { %705 = vperm.xlu0 %784, %v833_v54  }
 0x266   :  { %v198_v30 = vpop.f32.mrf.mxu0 }
 0x267   :  { %v205_v35 = vadd.f32 %v198_v30, %v152_v21 }
 0x268   :  { %v747_v20 = vpop.f32.mrf.mxu0 }
 0x269   :  { %208 = vst.msk [vmem:[#allocation4] sm:$0xff] %vm44_vm15, %v205_v35  ;;  %v338_v19 = vpop.f32.mrf.mxu1 }
 0x26a   :  { %v201_v31 = vpop.f32.mrf.mxu0  ;;  %v345_v37 = vadd.f32 %v338_v19, %v295_v16 }
 0x26b   :  { %v206_v33 = vadd.f32 %v201_v31, %v153_v15  ;;  %v753_v39 = vpop.f32.mrf.mxu1 }
 0x26c   :  { %347 = vst.msk [vmem:[#allocation4 + $0x10] sm:$0xff] %vm44_vm15, %v345_v37  ;;  %v748_v24 = vpop.f32.mrf.mxu0 }
 0x26d   :  { %209 = vst.msk [vmem:[#allocation4 + $0x8] sm:$0xff] %vm44_vm15, %v206_v33  ;;  %v341_v45 = vpop.f32.mrf.mxu1 }
 0x26e   :  { %v346_v59 = vadd.f32 %v341_v45, %v296_v43  ;;  %v477_v60 = vpop.f32.mrf.mxu0 }
 0x26f   :  { %v484_v62 = vadd.f32 %v477_v60, %v434_v44  ;;  %v754_v63 = vpop.f32.mrf.mxu1 }
 0x270   :  { %348 = vst.msk [vmem:[#allocation4 + $0x18] sm:$0xff] %vm44_vm15, %v346_v59  ;;  %v759_v1 = vpop.f32.mrf.mxu0  ;;  %v632_v32 = vld [vmem:[#allocation4] sm:$0xff] }
 0x271   :  { %486 = vst.msk [vmem:[#allocation4 + $0x20] sm:$0xff] %vm44_vm15, %v484_v62 }
 0x272   :  { %v480_v3 = vpop.f32.mrf.mxu0 }
 0x273   :  { %v485_v41 = vadd.f32 %v480_v3, %v435_v47  ;;  %v652_v25 = vld [vmem:[#allocation4 + $0x10] sm:$0xff] }
 0x274   :  { %v760_v48 = vpop.f32.mrf.mxu0  ;;  %v633_v53 = vld [vmem:[#allocation4 + $0x8] sm:$0xff] }
 0x275   :  { %487 = vst.msk [vmem:[#allocation4 + $0x28] sm:$0xff] %vm44_vm15, %v485_v41  ;;  %v616_v52 = vpop.f32.mrf.mxu1 }
 0x276   :  { %v623_v9 = vadd.f32 %v616_v52, %v573_v4 }
 0x277   :  { %v765_v61 = vpop.f32.mrf.mxu1  ;;  %v653_v46 = vld [vmem:[#allocation4 + $0x18] sm:$0xff] }
 0x278   :  { %625 = vst.msk [vmem:[#allocation4 + $0x30] sm:$0xff] %vm44_vm15, %v623_v9  ;;  %v672_v36 = vld [vmem:[#allocation4 + $0x20] sm:$0xff] }
 0x279   :  { %v619_v12 = vpop.f32.mrf.mxu1 }
 0x27a   :  { %v624_v13 = vadd.f32 %v619_v12, %v574_v11 }
 0x27b   :  { %v766_v0 = vpop.f32.mrf.mxu1 }
 0x27c   :  { %626 = vst.msk [vmem:[#allocation4 + $0x38] sm:$0xff] %vm44_vm15, %v624_v13  ;;  %v673_v54 = vld [vmem:[#allocation4 + $0x28] sm:$0xff] }
 0x27f   :  { %v692_v10 = vld [vmem:[#allocation4 + $0x30] sm:$0xff] }
 0x283   :  { %v693_v16 = vld [vmem:[#allocation4 + $0x38] sm:$0xff] }
 0x2bd   :  { %v641_v14 = vpop.permute.xlu1 %640 }
 0x2be   :  { %v648_v40 = vmul.f32 %v641_v14, %v632_v32 }
 0x2c1   :  { %v661_v17 = vpop.permute.xlu1 %660 }
 0x2c2   :  { %v646_v18 = vpop.permute.xlu0 %645  ;;  %v668_v27 = vmul.f32 %v661_v17, %v652_v25 }
 0x2c3   :  { %v649_v56 = vmul.f32 %v646_v18, %v633_v53 }
 0x2c4   :  { %v670_v50 = vadd.f32 %v668_v27, %v648_v40 }
 0x2c6   :  { %v666_v6 = vpop.permute.xlu0 %665 }
 0x2c7   :  { %v681_v7 = vpop.permute.xlu1 %680  ;;  %v669_v51 = vmul.f32 %v666_v6, %v653_v46 }
 0x2c8   :  { %v688_v42 = vmul.f32 %v681_v7, %v672_v36 }
 0x2c9   :  { %v671_v30 = vadd.f32 %v669_v51, %v649_v56 }
 0x2ca   :  { %v686_v49 = vpop.permute.xlu0 %685  ;;  %v690_v21 = vadd.f32 %v688_v42, %v670_v50 }
 0x2cb   :  { %v689_v26 = vmul.f32 %v686_v49, %v673_v54 }
 0x2cd   :  { %v701_v55 = vpop.permute.xlu1 %700  ;;  %v691_v23 = vadd.f32 %v689_v26, %v671_v30 }
 0x2ce   :  { %v708_v29 = vmul.f32 %v701_v55, %v692_v10 }
 0x2d0   :  { %v710_v35 = vadd.f32 %v708_v29, %v690_v21 }
 0x2d1   :  { %v706_v20 = vpop.permute.xlu0 %705 }
 0x2d2   :  { %v712_v15 = vmul.f32 0.25, %v710_v35  ;;  %v709_v19 = vmul.f32 %v706_v20, %v693_v16 }
 0x2d4   :  { %v721_v22 = vadd.f32 %v734_v38, %v712_v15  ;;  %v711_v28 = vadd.f32 %v709_v19, %v691_v23 }
 0x2d6   :  { %723 = vst.msk [vmem:[%s1157_s5] sm:$0xff] %vm44_vm15, %v721_v22  ;;  %v713_v31 = vmul.f32 0.25, %v711_v28 }
 0x2d8   :  { %v722_v37 = vadd.f32 %v734_v38, %v713_v31 }
 0x2da   :  { %724 = vst.msk [vmem:[%s1157_s5 + $0x8] sm:$0xff] %vm44_vm15, %v722_v37 }

</bundles_post_ra>
